<compile_context>
chip_gen: v6e
topology: v6e:2x2x1
jax: 0.10.0
libtpu: 0.0.40
codegen_flags: <defaults>
</compile_context>

<pallas_src>
import functools

import jax
import jax.numpy as jnp
from jax.experimental import pallas as pl
from jax.experimental.pallas import tpu as pltpu


# ---------------------------------------------------------------------------
# Kernel: one batch tile of TB samples, batch always in the lane dimension.
# ---------------------------------------------------------------------------
def _arrow_kernel(x_ref, w1_ref, b1_ref, w2_ref, b2_ref, w3_ref, b3_ref,
                  wfc_ref, bfc_ref, o_ref):
    # x_ref  : (5, 5, 3, TB)   input, (h, w, cin, batch-lanes)
    # w1_ref : (4, 16, 3)      conv1, one (Cout, Cin) slab per 2x2 tap
    # w2_ref : (32, 16)        w3_ref: (64, 32)
    # wfc_ref: (9, 256)        FC weights, columns ordered (p, c)
    # b*_ref : (C, 1)          o_ref: (9, TB)
    tb = x_ref.shape[-1]

    # Load the 25 spatial slabs once; each is (3, TB).
    xs = [[x_ref[i, j] for j in range(5)] for i in range(5)]

    # --- Conv2d(3,16,k=2) + ReLU -------------------------------------------
    # 4 kernel-tap matmuls over all 16 output positions at once.
    # Column order: q*(4*TB) + p*TB + b, q = ph*2+pw (pool-window element),
    # p = oh*2+ow (pooled position).  Only tile-aligned lane concats are used.
    def tap_operand(kh, kw):
        pieces = []
        for ph in range(2):
            for pw in range(2):
                for oh in range(2):
                    for ow in range(2):
                        pieces.append(xs[2 * oh + ph + kh][2 * ow + pw + kw])
        return jnp.concatenate(pieces, axis=1)                 # (3, 16*TB)

    acc = None
    for kh in range(2):
        for kw in range(2):
            d = jnp.dot(w1_ref[kh * 2 + kw], tap_operand(kh, kw),
                        preferred_element_type=jnp.float32)
            acc = d if acc is None else acc + d
    h1 = jnp.maximum(acc + b1_ref[...], 0.0)                   # (16, 16*TB)

    # --- MaxPool2d(2): reduce over the window axis q (tile-aligned slices) --
    n = 4 * tb
    mp = jnp.maximum(jnp.maximum(h1[:, 0 * n:1 * n], h1[:, 1 * n:2 * n]),
                     jnp.maximum(h1[:, 2 * n:3 * n], h1[:, 3 * n:4 * n]))

    # --- 1x1 convs + ReLU (channel matmuls, batch stays in lanes) -----------
    h2 = jnp.maximum(
        jnp.dot(w2_ref[...], mp, preferred_element_type=jnp.float32)
        + b2_ref[...], 0.0)                                    # (32, 4*TB)
    h3 = jnp.maximum(
        jnp.dot(w3_ref[...], h2, preferred_element_type=jnp.float32)
        + b3_ref[...], 0.0)                                    # (64, 4*TB)

    # --- Flatten (NCHW order) + Linear(256, 9) as one matmul ----------------
    # h3 columns are p*TB + b; stacking the 4 position slices along sublanes
    # makes rows p*64 + c (wfc columns were permuted to match on the host).
    flat = jnp.concatenate([h3[:, p * tb:(p + 1) * tb] for p in range(4)],
                           axis=0)                             # (256, TB)
    o_ref[...] = (jnp.dot(wfc_ref[...], flat,
                          preferred_element_type=jnp.float32) + bfc_ref[...])


# ---------------------------------------------------------------------------
# One-time parameter repacking (hoisted out of the per-call path).
# ---------------------------------------------------------------------------
def prepare_params(params):
    w1, b1, w2, b2, w3, b3, wfc, bfc = [jnp.asarray(p, jnp.float32)
                                        for p in params]
    # conv1 (Cout=16, Cin=3, kh=2, kw=2) -> per-tap (kh*2+kw, Cout, Cin)
    w1t = jnp.transpose(w1, (2, 3, 0, 1)).reshape(4, 16, 3)
    w2m = w2.reshape(32, 16)
    w3m = w3.reshape(64, 32)
    # Linear weight Wfc[o, c*4 + p] -> columns reordered to (p, c)
    wfm = jnp.transpose(wfc.reshape(9, 64, 4), (0, 2, 1)).reshape(9, 256)
    return (w1t, b1.reshape(16, 1), w2m, b2.reshape(32, 1),
            w3m, b3.reshape(64, 1), wfm, bfc.reshape(9, 1))


# ---------------------------------------------------------------------------
# Forward wrapper: batch grid + lane-dense layout.
# ---------------------------------------------------------------------------
@functools.partial(jax.jit, static_argnames=("block_b",))
def arrow_translator_forward(x, prepared, block_b=None):
    """x: (B, 5, 5, 3) float32 NHWC (as fed to the PyTorch module). -> (B, 9)."""
    w1t, b1c, w2m, b2c, w3m, b3c, wfm, bfcc = prepared
    B = x.shape[0]
    assert x.shape[1:] == (5, 5, 3)

    if block_b is None:
        block_b = min(512, ((B + 127) // 128) * 128)   # lane-tile aligned TB
    tb = block_b
    b_pad = ((B + tb - 1) // tb) * tb

    # Batch -> lanes: (B,5,5,3) -> (5,5,3,B); zero-pad batch to the tile.
    xt = jnp.transpose(x.astype(jnp.float32), (1, 2, 3, 0))
    if b_pad != B:
        xt = jnp.pad(xt, ((0, 0), (0, 0), (0, 0), (0, b_pad - B)))

    out = pl.pallas_call(
        _arrow_kernel,
        grid=(b_pad // tb,),
        in_specs=[
            pl.BlockSpec((5, 5, 3, tb), lambda i: (0, 0, 0, i)),  # input tile
            pl.BlockSpec((4, 16, 3), lambda i: (0, 0, 0)),        # conv1 taps
            pl.BlockSpec((16, 1), lambda i: (0, 0)),
            pl.BlockSpec((32, 16), lambda i: (0, 0)),
            pl.BlockSpec((32, 1), lambda i: (0, 0)),
            pl.BlockSpec((64, 32), lambda i: (0, 0)),
            pl.BlockSpec((64, 1), lambda i: (0, 0)),
            pl.BlockSpec((9, 256), lambda i: (0, 0)),
            pl.BlockSpec((9, 1), lambda i: (0, 0)),
        ],
        out_specs=pl.BlockSpec((9, tb), lambda i: (0, i)),
        out_shape=jax.ShapeDtypeStruct((9, b_pad), jnp.float32),
        compiler_params=pltpu.CompilerParams(
            dimension_semantics=("parallel",),       # shard batch tiles on v7x
            vmem_limit_bytes=32 * 1024 * 1024),
    )(xt, w1t, b1c, w2m, b2c, w3m, b3c, wfm, bfcc)

    return out[:, :B].T                                # (B, 9) logits


# ---------------------------------------------------------------------------
# Pure-JAX reference (matches the PyTorch module exactly, NCHW path).
# ---------------------------------------------------------------------------
def _reference(x, params):
    w1, b1, w2, b2, w3, b3, wfc, bfc = params
    dn = ("NCHW", "OIHW", "NCHW")
    y = jnp.transpose(x, (0, 3, 1, 2))
    y = jax.lax.conv_general_dilated(y, w1, (1, 1), "VALID",
                                     dimension_numbers=dn) + b1[None, :, None, None]
    y = jnp.maximum(y, 0.0)
    y = jax.lax.reduce_window(y, -jnp.inf, jax.lax.max,
                              (1, 1, 2, 2), (1, 1, 2, 2), "VALID")
    y = jax.lax.conv_general_dilated(y, w2, (1, 1), "VALID",
                                     dimension_numbers=dn) + b2[None, :, None, None]
    y = jnp.maximum(y, 0.0)
    y = jax.lax.conv_general_dilated(y, w3, (1, 1), "VALID",
                                     dimension_numbers=dn) + b3[None, :, None, None]
    y = jnp.maximum(y, 0.0)
    flat = y.reshape(y.shape[0], -1)
    return flat @ wfc.T + bfc


def _init_params(key):
    ks = jax.random.split(key, 8)
    w1 = 0.1 * jax.random.normal(ks[0], (16, 3, 2, 2), jnp.float32)
    b1 = 0.1 * jax.random.normal(ks[1], (16,), jnp.float32)
    w2 = 0.1 * jax.random.normal(ks[2], (32, 16, 1, 1), jnp.float32)
    b2 = 0.1 * jax.random.normal(ks[3], (32,), jnp.float32)
    w3 = 0.1 * jax.random.normal(ks[4], (64, 32, 1, 1), jnp.float32)
    b3 = 0.1 * jax.random.normal(ks[5], (64,), jnp.float32)
    wfc = 0.1 * jax.random.normal(ks[6], (9, 256), jnp.float32)
    bfc = 0.1 * jax.random.normal(ks[7], (9,), jnp.float32)
    return (w1, b1, w2, b2, w3, b3, wfc, bfc)


if __name__ == "__main__":
    key = jax.random.PRNGKey(0)
    pkey, xkey, x2key = jax.random.split(key, 3)
    params = _init_params(pkey)
    prepared = prepare_params(params)

    # Small demo batch (the module implies 5x5x3 Arrow observations).
    B = 2
    x = jax.random.uniform(xkey, (B, 5, 5, 3), jnp.float32)
    out = jax.block_until_ready(arrow_translator_forward(x, prepared))
    ref = _reference(x, params)
    assert out.shape == (B, 9)
    assert jnp.allclose(out, ref, atol=1e-3, rtol=1e-3), (out, ref)

    # Exercise the multi-tile batch grid (3 grid steps + batch padding).
    B2 = 300
    x2 = jax.random.uniform(x2key, (B2, 5, 5, 3), jnp.float32)
    out2 = jax.block_until_ready(
        arrow_translator_forward(x2, prepared, block_b=128))
    ref2 = _reference(x2, params)
    assert jnp.allclose(out2, ref2, atol=1e-3, rtol=1e-3)

    # predict() equivalent (argmax over logits) in plain JAX glue.
    _ = jnp.argmax(out, axis=1)

    print("KERNEL_OK")
</pallas_src>

<mosaic_0001>
module attributes {stable_mosaic.version = 11 : i64} {
  func.func @_arrow_kernel(%arg0: i32, %arg1: memref<5x5x3x128xf32, #tpu.memory_space<vmem>>, %arg2: memref<4x16x3xf32, #tpu.memory_space<vmem>>, %arg3: memref<16x1xf32, #tpu.memory_space<vmem>>, %arg4: memref<32x16xf32, #tpu.memory_space<vmem>>, %arg5: memref<32x1xf32, #tpu.memory_space<vmem>>, %arg6: memref<64x32xf32, #tpu.memory_space<vmem>>, %arg7: memref<64x1xf32, #tpu.memory_space<vmem>>, %arg8: memref<9x256xf32, #tpu.memory_space<vmem>>, %arg9: memref<9x1xf32, #tpu.memory_space<vmem>>, %arg10: memref<9x128xf32, #tpu.memory_space<vmem>>) attributes {dimension_semantics = [#tpu.dimension_semantics<parallel>], iteration_bounds = array<i64: 1>, scalar_prefetch = 0 : i64, scratch_operands = 0 : i64, tpu.core_type = #tpu.core_type<tc>, window_params = [{transform_indices = @transform_0, window_bounds = array<i64: 5, 5, 3, 128>}, {pipeline_mode = #tpu.pipeline_mode<synchronous>, transform_indices = @transform_1, window_bounds = array<i64: 4, 16, 3>}, {pipeline_mode = #tpu.pipeline_mode<synchronous>, transform_indices = @transform_2, window_bounds = array<i64: 16, 1>}, {pipeline_mode = #tpu.pipeline_mode<synchronous>, transform_indices = @transform_3, window_bounds = array<i64: 32, 16>}, {pipeline_mode = #tpu.pipeline_mode<synchronous>, transform_indices = @transform_4, window_bounds = array<i64: 32, 1>}, {pipeline_mode = #tpu.pipeline_mode<synchronous>, transform_indices = @transform_5, window_bounds = array<i64: 64, 32>}, {pipeline_mode = #tpu.pipeline_mode<synchronous>, transform_indices = @transform_6, window_bounds = array<i64: 64, 1>}, {pipeline_mode = #tpu.pipeline_mode<synchronous>, transform_indices = @transform_7, window_bounds = array<i64: 9, 256>}, {pipeline_mode = #tpu.pipeline_mode<synchronous>, transform_indices = @transform_8, window_bounds = array<i64: 9, 1>}, {transform_indices = @transform_9, window_bounds = array<i64: 9, 128>}]} {
    %c0 = arith.constant 0 : index
    %c0_0 = arith.constant 0 : index
    %c0_1 = arith.constant 0 : index
    %c0_2 = arith.constant 0 : index
    %0 = vector.load %arg1[%c0, %c0_0, %c0_1, %c0_2] : memref<5x5x3x128xf32, #tpu.memory_space<vmem>>, vector<1x1x3x128xf32>
    %1 = vector.shape_cast %0 : vector<1x1x3x128xf32> to vector<3x128xf32>
    %c0_3 = arith.constant 0 : index
    %c1 = arith.constant 1 : index
    %c0_4 = arith.constant 0 : index
    %c0_5 = arith.constant 0 : index
    %2 = vector.load %arg1[%c0_3, %c1, %c0_4, %c0_5] : memref<5x5x3x128xf32, #tpu.memory_space<vmem>>, vector<1x1x3x128xf32>
    %3 = vector.shape_cast %2 : vector<1x1x3x128xf32> to vector<3x128xf32>
    %c0_6 = arith.constant 0 : index
    %c2 = arith.constant 2 : index
    %c0_7 = arith.constant 0 : index
    %c0_8 = arith.constant 0 : index
    %4 = vector.load %arg1[%c0_6, %c2, %c0_7, %c0_8] : memref<5x5x3x128xf32, #tpu.memory_space<vmem>>, vector<1x1x3x128xf32>
    %5 = vector.shape_cast %4 : vector<1x1x3x128xf32> to vector<3x128xf32>
    %c0_9 = arith.constant 0 : index
    %c3 = arith.constant 3 : index
    %c0_10 = arith.constant 0 : index
    %c0_11 = arith.constant 0 : index
    %6 = vector.load %arg1[%c0_9, %c3, %c0_10, %c0_11] : memref<5x5x3x128xf32, #tpu.memory_space<vmem>>, vector<1x1x3x128xf32>
    %7 = vector.shape_cast %6 : vector<1x1x3x128xf32> to vector<3x128xf32>
    %c0_12 = arith.constant 0 : index
    %c4 = arith.constant 4 : index
    %c0_13 = arith.constant 0 : index
    %c0_14 = arith.constant 0 : index
    %8 = vector.load %arg1[%c0_12, %c4, %c0_13, %c0_14] : memref<5x5x3x128xf32, #tpu.memory_space<vmem>>, vector<1x1x3x128xf32>
    %9 = vector.shape_cast %8 : vector<1x1x3x128xf32> to vector<3x128xf32>
    %c1_15 = arith.constant 1 : index
    %c0_16 = arith.constant 0 : index
    %c0_17 = arith.constant 0 : index
    %c0_18 = arith.constant 0 : index
    %10 = vector.load %arg1[%c1_15, %c0_16, %c0_17, %c0_18] : memref<5x5x3x128xf32, #tpu.memory_space<vmem>>, vector<1x1x3x128xf32>
    %11 = vector.shape_cast %10 : vector<1x1x3x128xf32> to vector<3x128xf32>
    %c1_19 = arith.constant 1 : index
    %c1_20 = arith.constant 1 : index
    %c0_21 = arith.constant 0 : index
    %c0_22 = arith.constant 0 : index
    %12 = vector.load %arg1[%c1_19, %c1_20, %c0_21, %c0_22] : memref<5x5x3x128xf32, #tpu.memory_space<vmem>>, vector<1x1x3x128xf32>
    %13 = vector.shape_cast %12 : vector<1x1x3x128xf32> to vector<3x128xf32>
    %c1_23 = arith.constant 1 : index
    %c2_24 = arith.constant 2 : index
    %c0_25 = arith.constant 0 : index
    %c0_26 = arith.constant 0 : index
    %14 = vector.load %arg1[%c1_23, %c2_24, %c0_25, %c0_26] : memref<5x5x3x128xf32, #tpu.memory_space<vmem>>, vector<1x1x3x128xf32>
    %15 = vector.shape_cast %14 : vector<1x1x3x128xf32> to vector<3x128xf32>
    %c1_27 = arith.constant 1 : index
    %c3_28 = arith.constant 3 : index
    %c0_29 = arith.constant 0 : index
    %c0_30 = arith.constant 0 : index
    %16 = vector.load %arg1[%c1_27, %c3_28, %c0_29, %c0_30] : memref<5x5x3x128xf32, #tpu.memory_space<vmem>>, vector<1x1x3x128xf32>
    %17 = vector.shape_cast %16 : vector<1x1x3x128xf32> to vector<3x128xf32>
    %c1_31 = arith.constant 1 : index
    %c4_32 = arith.constant 4 : index
    %c0_33 = arith.constant 0 : index
    %c0_34 = arith.constant 0 : index
    %18 = vector.load %arg1[%c1_31, %c4_32, %c0_33, %c0_34] : memref<5x5x3x128xf32, #tpu.memory_space<vmem>>, vector<1x1x3x128xf32>
    %19 = vector.shape_cast %18 : vector<1x1x3x128xf32> to vector<3x128xf32>
    %c2_35 = arith.constant 2 : index
    %c0_36 = arith.constant 0 : index
    %c0_37 = arith.constant 0 : index
    %c0_38 = arith.constant 0 : index
    %20 = vector.load %arg1[%c2_35, %c0_36, %c0_37, %c0_38] : memref<5x5x3x128xf32, #tpu.memory_space<vmem>>, vector<1x1x3x128xf32>
    %21 = vector.shape_cast %20 : vector<1x1x3x128xf32> to vector<3x128xf32>
    %c2_39 = arith.constant 2 : index
    %c1_40 = arith.constant 1 : index
    %c0_41 = arith.constant 0 : index
    %c0_42 = arith.constant 0 : index
    %22 = vector.load %arg1[%c2_39, %c1_40, %c0_41, %c0_42] : memref<5x5x3x128xf32, #tpu.memory_space<vmem>>, vector<1x1x3x128xf32>
    %23 = vector.shape_cast %22 : vector<1x1x3x128xf32> to vector<3x128xf32>
    %c2_43 = arith.constant 2 : index
    %c2_44 = arith.constant 2 : index
    %c0_45 = arith.constant 0 : index
    %c0_46 = arith.constant 0 : index
    %24 = vector.load %arg1[%c2_43, %c2_44, %c0_45, %c0_46] : memref<5x5x3x128xf32, #tpu.memory_space<vmem>>, vector<1x1x3x128xf32>
    %25 = vector.shape_cast %24 : vector<1x1x3x128xf32> to vector<3x128xf32>
    %c2_47 = arith.constant 2 : index
    %c3_48 = arith.constant 3 : index
    %c0_49 = arith.constant 0 : index
    %c0_50 = arith.constant 0 : index
    %26 = vector.load %arg1[%c2_47, %c3_48, %c0_49, %c0_50] : memref<5x5x3x128xf32, #tpu.memory_space<vmem>>, vector<1x1x3x128xf32>
    %27 = vector.shape_cast %26 : vector<1x1x3x128xf32> to vector<3x128xf32>
    %c2_51 = arith.constant 2 : index
    %c4_52 = arith.constant 4 : index
    %c0_53 = arith.constant 0 : index
    %c0_54 = arith.constant 0 : index
    %28 = vector.load %arg1[%c2_51, %c4_52, %c0_53, %c0_54] : memref<5x5x3x128xf32, #tpu.memory_space<vmem>>, vector<1x1x3x128xf32>
    %29 = vector.shape_cast %28 : vector<1x1x3x128xf32> to vector<3x128xf32>
    %c3_55 = arith.constant 3 : index
    %c0_56 = arith.constant 0 : index
    %c0_57 = arith.constant 0 : index
    %c0_58 = arith.constant 0 : index
    %30 = vector.load %arg1[%c3_55, %c0_56, %c0_57, %c0_58] : memref<5x5x3x128xf32, #tpu.memory_space<vmem>>, vector<1x1x3x128xf32>
    %31 = vector.shape_cast %30 : vector<1x1x3x128xf32> to vector<3x128xf32>
    %c3_59 = arith.constant 3 : index
    %c1_60 = arith.constant 1 : index
    %c0_61 = arith.constant 0 : index
    %c0_62 = arith.constant 0 : index
    %32 = vector.load %arg1[%c3_59, %c1_60, %c0_61, %c0_62] : memref<5x5x3x128xf32, #tpu.memory_space<vmem>>, vector<1x1x3x128xf32>
    %33 = vector.shape_cast %32 : vector<1x1x3x128xf32> to vector<3x128xf32>
    %c3_63 = arith.constant 3 : index
    %c2_64 = arith.constant 2 : index
    %c0_65 = arith.constant 0 : index
    %c0_66 = arith.constant 0 : index
    %34 = vector.load %arg1[%c3_63, %c2_64, %c0_65, %c0_66] : memref<5x5x3x128xf32, #tpu.memory_space<vmem>>, vector<1x1x3x128xf32>
    %35 = vector.shape_cast %34 : vector<1x1x3x128xf32> to vector<3x128xf32>
    %c3_67 = arith.constant 3 : index
    %c3_68 = arith.constant 3 : index
    %c0_69 = arith.constant 0 : index
    %c0_70 = arith.constant 0 : index
    %36 = vector.load %arg1[%c3_67, %c3_68, %c0_69, %c0_70] : memref<5x5x3x128xf32, #tpu.memory_space<vmem>>, vector<1x1x3x128xf32>
    %37 = vector.shape_cast %36 : vector<1x1x3x128xf32> to vector<3x128xf32>
    %c3_71 = arith.constant 3 : index
    %c4_72 = arith.constant 4 : index
    %c0_73 = arith.constant 0 : index
    %c0_74 = arith.constant 0 : index
    %38 = vector.load %arg1[%c3_71, %c4_72, %c0_73, %c0_74] : memref<5x5x3x128xf32, #tpu.memory_space<vmem>>, vector<1x1x3x128xf32>
    %39 = vector.shape_cast %38 : vector<1x1x3x128xf32> to vector<3x128xf32>
    %c4_75 = arith.constant 4 : index
    %c0_76 = arith.constant 0 : index
    %c0_77 = arith.constant 0 : index
    %c0_78 = arith.constant 0 : index
    %40 = vector.load %arg1[%c4_75, %c0_76, %c0_77, %c0_78] : memref<5x5x3x128xf32, #tpu.memory_space<vmem>>, vector<1x1x3x128xf32>
    %41 = vector.shape_cast %40 : vector<1x1x3x128xf32> to vector<3x128xf32>
    %c4_79 = arith.constant 4 : index
    %c1_80 = arith.constant 1 : index
    %c0_81 = arith.constant 0 : index
    %c0_82 = arith.constant 0 : index
    %42 = vector.load %arg1[%c4_79, %c1_80, %c0_81, %c0_82] : memref<5x5x3x128xf32, #tpu.memory_space<vmem>>, vector<1x1x3x128xf32>
    %43 = vector.shape_cast %42 : vector<1x1x3x128xf32> to vector<3x128xf32>
    %c4_83 = arith.constant 4 : index
    %c2_84 = arith.constant 2 : index
    %c0_85 = arith.constant 0 : index
    %c0_86 = arith.constant 0 : index
    %44 = vector.load %arg1[%c4_83, %c2_84, %c0_85, %c0_86] : memref<5x5x3x128xf32, #tpu.memory_space<vmem>>, vector<1x1x3x128xf32>
    %45 = vector.shape_cast %44 : vector<1x1x3x128xf32> to vector<3x128xf32>
    %c4_87 = arith.constant 4 : index
    %c3_88 = arith.constant 3 : index
    %c0_89 = arith.constant 0 : index
    %c0_90 = arith.constant 0 : index
    %46 = vector.load %arg1[%c4_87, %c3_88, %c0_89, %c0_90] : memref<5x5x3x128xf32, #tpu.memory_space<vmem>>, vector<1x1x3x128xf32>
    %47 = vector.shape_cast %46 : vector<1x1x3x128xf32> to vector<3x128xf32>
    %c4_91 = arith.constant 4 : index
    %c4_92 = arith.constant 4 : index
    %c0_93 = arith.constant 0 : index
    %c0_94 = arith.constant 0 : index
    %48 = vector.load %arg1[%c4_91, %c4_92, %c0_93, %c0_94] : memref<5x5x3x128xf32, #tpu.memory_space<vmem>>, vector<1x1x3x128xf32>
    %49 = vector.shape_cast %48 : vector<1x1x3x128xf32> to vector<3x128xf32>
    %c0_95 = arith.constant 0 : index
    %c0_96 = arith.constant 0 : index
    %c0_97 = arith.constant 0 : index
    %50 = vector.load %arg2[%c0_95, %c0_96, %c0_97] : memref<4x16x3xf32, #tpu.memory_space<vmem>>, vector<1x16x3xf32>
    %51 = vector.shape_cast %50 : vector<1x16x3xf32> to vector<16x3xf32>
    %52 = tpu.concatenate %1, %5, %21, %25, %3, %7, %23, %27, %11, %15, %31, %35, %13, %17, %33, %37 in 1 : vector<3x128xf32>, vector<3x128xf32>, vector<3x128xf32>, vector<3x128xf32>, vector<3x128xf32>, vector<3x128xf32>, vector<3x128xf32>, vector<3x128xf32>, vector<3x128xf32>, vector<3x128xf32>, vector<3x128xf32>, vector<3x128xf32>, vector<3x128xf32>, vector<3x128xf32>, vector<3x128xf32>, vector<3x128xf32> -> vector<3x2048xf32>
    %cst = arith.constant dense<0.000000e+00> : vector<16x2048xf32>
    %53 = tpu.matmul %51, %52, %cst {dimension_numbers = #tpu.dot_dimension_numbers<[1], [0], [0], [1], [0, 0, 1, 1], [], []>} : vector<16x3xf32>, vector<3x2048xf32>, vector<16x2048xf32> -> vector<16x2048xf32>
    %c1_98 = arith.constant 1 : index
    %c0_99 = arith.constant 0 : index
    %c0_100 = arith.constant 0 : index
    %54 = vector.load %arg2[%c1_98, %c0_99, %c0_100] : memref<4x16x3xf32, #tpu.memory_space<vmem>>, vector<1x16x3xf32>
    %55 = vector.shape_cast %54 : vector<1x16x3xf32> to vector<16x3xf32>
    %56 = tpu.concatenate %3, %7, %23, %27, %5, %9, %25, %29, %13, %17, %33, %37, %15, %19, %35, %39 in 1 : vector<3x128xf32>, vector<3x128xf32>, vector<3x128xf32>, vector<3x128xf32>, vector<3x128xf32>, vector<3x128xf32>, vector<3x128xf32>, vector<3x128xf32>, vector<3x128xf32>, vector<3x128xf32>, vector<3x128xf32>, vector<3x128xf32>, vector<3x128xf32>, vector<3x128xf32>, vector<3x128xf32>, vector<3x128xf32> -> vector<3x2048xf32>
    %cst_101 = arith.constant dense<0.000000e+00> : vector<16x2048xf32>
    %57 = tpu.matmul %55, %56, %cst_101 {dimension_numbers = #tpu.dot_dimension_numbers<[1], [0], [0], [1], [0, 0, 1, 1], [], []>} : vector<16x3xf32>, vector<3x2048xf32>, vector<16x2048xf32> -> vector<16x2048xf32>
    %58 = arith.addf %53, %57 : vector<16x2048xf32>
    %c2_102 = arith.constant 2 : index
    %c0_103 = arith.constant 0 : index
    %c0_104 = arith.constant 0 : index
    %59 = vector.load %arg2[%c2_102, %c0_103, %c0_104] : memref<4x16x3xf32, #tpu.memory_space<vmem>>, vector<1x16x3xf32>
    %60 = vector.shape_cast %59 : vector<1x16x3xf32> to vector<16x3xf32>
    %61 = tpu.concatenate %11, %15, %31, %35, %13, %17, %33, %37, %21, %25, %41, %45, %23, %27, %43, %47 in 1 : vector<3x128xf32>, vector<3x128xf32>, vector<3x128xf32>, vector<3x128xf32>, vector<3x128xf32>, vector<3x128xf32>, vector<3x128xf32>, vector<3x128xf32>, vector<3x128xf32>, vector<3x128xf32>, vector<3x128xf32>, vector<3x128xf32>, vector<3x128xf32>, vector<3x128xf32>, vector<3x128xf32>, vector<3x128xf32> -> vector<3x2048xf32>
    %cst_105 = arith.constant dense<0.000000e+00> : vector<16x2048xf32>
    %62 = tpu.matmul %60, %61, %cst_105 {dimension_numbers = #tpu.dot_dimension_numbers<[1], [0], [0], [1], [0, 0, 1, 1], [], []>} : vector<16x3xf32>, vector<3x2048xf32>, vector<16x2048xf32> -> vector<16x2048xf32>
    %63 = arith.addf %58, %62 : vector<16x2048xf32>
    %c3_106 = arith.constant 3 : index
    %c0_107 = arith.constant 0 : index
    %c0_108 = arith.constant 0 : index
    %64 = vector.load %arg2[%c3_106, %c0_107, %c0_108] : memref<4x16x3xf32, #tpu.memory_space<vmem>>, vector<1x16x3xf32>
    %65 = vector.shape_cast %64 : vector<1x16x3xf32> to vector<16x3xf32>
    %66 = tpu.concatenate %13, %17, %33, %37, %15, %19, %35, %39, %23, %27, %43, %47, %25, %29, %45, %49 in 1 : vector<3x128xf32>, vector<3x128xf32>, vector<3x128xf32>, vector<3x128xf32>, vector<3x128xf32>, vector<3x128xf32>, vector<3x128xf32>, vector<3x128xf32>, vector<3x128xf32>, vector<3x128xf32>, vector<3x128xf32>, vector<3x128xf32>, vector<3x128xf32>, vector<3x128xf32>, vector<3x128xf32>, vector<3x128xf32> -> vector<3x2048xf32>
    %cst_109 = arith.constant dense<0.000000e+00> : vector<16x2048xf32>
    %67 = tpu.matmul %65, %66, %cst_109 {dimension_numbers = #tpu.dot_dimension_numbers<[1], [0], [0], [1], [0, 0, 1, 1], [], []>} : vector<16x3xf32>, vector<3x2048xf32>, vector<16x2048xf32> -> vector<16x2048xf32>
    %68 = arith.addf %63, %67 : vector<16x2048xf32>
    %c0_110 = arith.constant 0 : index
    %c0_111 = arith.constant 0 : index
    %69 = vector.load %arg3[%c0_110, %c0_111] : memref<16x1xf32, #tpu.memory_space<vmem>>, vector<16x1xf32>
    %70 = vector.broadcast %69 : vector<16x1xf32> to vector<16x2048xf32>
    %71 = arith.addf %68, %70 : vector<16x2048xf32>
    %cst_112 = arith.constant 0.000000e+00 : f32
    %72 = vector.broadcast %cst_112 : f32 to vector<16x2048xf32>
    %73 = arith.maximumf %71, %72 : vector<16x2048xf32>
    %74 = vector.extract_strided_slice %73 {offsets = [0, 0], sizes = [16, 512], strides = [1, 1]} : vector<16x2048xf32> to vector<16x512xf32>
    %75 = vector.extract_strided_slice %73 {offsets = [0, 512], sizes = [16, 512], strides = [1, 1]} : vector<16x2048xf32> to vector<16x512xf32>
    %76 = arith.maximumf %74, %75 : vector<16x512xf32>
    %77 = vector.extract_strided_slice %73 {offsets = [0, 1024], sizes = [16, 512], strides = [1, 1]} : vector<16x2048xf32> to vector<16x512xf32>
    %78 = vector.extract_strided_slice %73 {offsets = [0, 1536], sizes = [16, 512], strides = [1, 1]} : vector<16x2048xf32> to vector<16x512xf32>
    %79 = arith.maximumf %77, %78 : vector<16x512xf32>
    %80 = arith.maximumf %76, %79 : vector<16x512xf32>
    %c0_113 = arith.constant 0 : index
    %c0_114 = arith.constant 0 : index
    %81 = vector.load %arg4[%c0_113, %c0_114] : memref<32x16xf32, #tpu.memory_space<vmem>>, vector<32x16xf32>
    %cst_115 = arith.constant dense<0.000000e+00> : vector<32x512xf32>
    %82 = tpu.matmul %81, %80, %cst_115 {dimension_numbers = #tpu.dot_dimension_numbers<[1], [0], [0], [1], [0, 0, 1, 1], [], []>} : vector<32x16xf32>, vector<16x512xf32>, vector<32x512xf32> -> vector<32x512xf32>
    %c0_116 = arith.constant 0 : index
    %c0_117 = arith.constant 0 : index
    %83 = vector.load %arg5[%c0_116, %c0_117] : memref<32x1xf32, #tpu.memory_space<vmem>>, vector<32x1xf32>
    %84 = vector.broadcast %83 : vector<32x1xf32> to vector<32x512xf32>
    %85 = arith.addf %82, %84 : vector<32x512xf32>
    %cst_118 = arith.constant 0.000000e+00 : f32
    %86 = vector.broadcast %cst_118 : f32 to vector<32x512xf32>
    %87 = arith.maximumf %85, %86 : vector<32x512xf32>
    %c0_119 = arith.constant 0 : index
    %c0_120 = arith.constant 0 : index
    %88 = vector.load %arg6[%c0_119, %c0_120] : memref<64x32xf32, #tpu.memory_space<vmem>>, vector<64x32xf32>
    %cst_121 = arith.constant dense<0.000000e+00> : vector<64x512xf32>
    %89 = tpu.matmul %88, %87, %cst_121 {dimension_numbers = #tpu.dot_dimension_numbers<[1], [0], [0], [1], [0, 0, 1, 1], [], []>} : vector<64x32xf32>, vector<32x512xf32>, vector<64x512xf32> -> vector<64x512xf32>
    %c0_122 = arith.constant 0 : index
    %c0_123 = arith.constant 0 : index
    %90 = vector.load %arg7[%c0_122, %c0_123] : memref<64x1xf32, #tpu.memory_space<vmem>>, vector<64x1xf32>
    %91 = vector.broadcast %90 : vector<64x1xf32> to vector<64x512xf32>
    %92 = arith.addf %89, %91 : vector<64x512xf32>
    %cst_124 = arith.constant 0.000000e+00 : f32
    %93 = vector.broadcast %cst_124 : f32 to vector<64x512xf32>
    %94 = arith.maximumf %92, %93 : vector<64x512xf32>
    %95 = vector.extract_strided_slice %94 {offsets = [0, 0], sizes = [64, 128], strides = [1, 1]} : vector<64x512xf32> to vector<64x128xf32>
    %96 = vector.extract_strided_slice %94 {offsets = [0, 128], sizes = [64, 128], strides = [1, 1]} : vector<64x512xf32> to vector<64x128xf32>
    %97 = vector.extract_strided_slice %94 {offsets = [0, 256], sizes = [64, 128], strides = [1, 1]} : vector<64x512xf32> to vector<64x128xf32>
    %98 = vector.extract_strided_slice %94 {offsets = [0, 384], sizes = [64, 128], strides = [1, 1]} : vector<64x512xf32> to vector<64x128xf32>
    %99 = tpu.concatenate %95, %96, %97, %98 in 0 : vector<64x128xf32>, vector<64x128xf32>, vector<64x128xf32>, vector<64x128xf32> -> vector<256x128xf32>
    %c0_125 = arith.constant 0 : index
    %c0_126 = arith.constant 0 : index
    %100 = vector.load %arg8[%c0_125, %c0_126] : memref<9x256xf32, #tpu.memory_space<vmem>>, vector<9x256xf32>
    %cst_127 = arith.constant dense<0.000000e+00> : vector<9x128xf32>
    %101 = tpu.matmul %100, %99, %cst_127 {dimension_numbers = #tpu.dot_dimension_numbers<[1], [0], [0], [1], [0, 0, 1, 1], [], []>} : vector<9x256xf32>, vector<256x128xf32>, vector<9x128xf32> -> vector<9x128xf32>
    %c0_128 = arith.constant 0 : index
    %c0_129 = arith.constant 0 : index
    %102 = vector.load %arg9[%c0_128, %c0_129] : memref<9x1xf32, #tpu.memory_space<vmem>>, vector<9x1xf32>
    %103 = vector.broadcast %102 : vector<9x1xf32> to vector<9x128xf32>
    %104 = arith.addf %101, %103 : vector<9x128xf32>
    %c0_130 = arith.constant 0 : index
    %c0_131 = arith.constant 0 : index
    %105 = vector.load %arg10[%c0_130, %c0_131] : memref<9x128xf32, #tpu.memory_space<vmem>>, vector<9x128xf32>
    tpu.vector_store %arg10[%c0_130, %c0_131], %104 {strides = array<i32>} : memref<9x128xf32, #tpu.memory_space<vmem>>, vector<9x128xf32>,
    return
  }
  func.func @transform_0(%arg0: i32) -> (i32, i32, i32, i32) {
    %c0_i32 = arith.constant 0 : i32
    %c0_i32_0 = arith.constant 0 : i32
    %c0_i32_1 = arith.constant 0 : i32
    %c0_i32_2 = arith.constant 0 : i32
    return %c0_i32, %c0_i32_0, %c0_i32_1, %arg0 : i32, i32, i32, i32
  }
  func.func @transform_1(%arg0: i32) -> (i32, i32, i32) {
    %c0_i32 = arith.constant 0 : i32
    %c0_i32_0 = arith.constant 0 : i32
    %c0_i32_1 = arith.constant 0 : i32
    %c0_i32_2 = arith.constant 0 : i32
    return %c0_i32, %c0_i32_0, %c0_i32_1 : i32, i32, i32
  }
  func.func @transform_2(%arg0: i32) -> (i32, i32) {
    %c0_i32 = arith.constant 0 : i32
    %c0_i32_0 = arith.constant 0 : i32
    %c0_i32_1 = arith.constant 0 : i32
    return %c0_i32, %c0_i32_0 : i32, i32
  }
  func.func @transform_3(%arg0: i32) -> (i32, i32) {
    %c0_i32 = arith.constant 0 : i32
    %c0_i32_0 = arith.constant 0 : i32
    %c0_i32_1 = arith.constant 0 : i32
    return %c0_i32, %c0_i32_0 : i32, i32
  }
  func.func @transform_4(%arg0: i32) -> (i32, i32) {
    %c0_i32 = arith.constant 0 : i32
    %c0_i32_0 = arith.constant 0 : i32
    %c0_i32_1 = arith.constant 0 : i32
    return %c0_i32, %c0_i32_0 : i32, i32
  }
  func.func @transform_5(%arg0: i32) -> (i32, i32) {
    %c0_i32 = arith.constant 0 : i32
    %c0_i32_0 = arith.constant 0 : i32
    %c0_i32_1 = arith.constant 0 : i32
    return %c0_i32, %c0_i32_0 : i32, i32
  }
  func.func @transform_6(%arg0: i32) -> (i32, i32) {
    %c0_i32 = arith.constant 0 : i32
    %c0_i32_0 = arith.constant 0 : i32
    %c0_i32_1 = arith.constant 0 : i32
    return %c0_i32, %c0_i32_0 : i32, i32
  }
  func.func @transform_7(%arg0: i32) -> (i32, i32) {
    %c0_i32 = arith.constant 0 : i32
    %c0_i32_0 = arith.constant 0 : i32
    %c0_i32_1 = arith.constant 0 : i32
    return %c0_i32, %c0_i32_0 : i32, i32
  }
  func.func @transform_8(%arg0: i32) -> (i32, i32) {
    %c0_i32 = arith.constant 0 : i32
    %c0_i32_0 = arith.constant 0 : i32
    %c0_i32_1 = arith.constant 0 : i32
    return %c0_i32, %c0_i32_0 : i32, i32
  }
  func.func @transform_9(%arg0: i32) -> (i32, i32) {
    %c0_i32 = arith.constant 0 : i32
    %c0_i32_0 = arith.constant 0 : i32
    return %c0_i32, %arg0 : i32, i32
  }
}

</mosaic_0001>

<bundles_post_ra>
// kernel: arrow_translator_forward.1
= control target key start
LH: loop header
LB: loop body
LE: loop exit
PB: predicated region body
PF: predicated region fallthrough
CT: control target
= control target key end

     0   :  { %vm93_vm0 = vcmask 1042432   ;;  %v4675_v2 = vmov 0.0   ;;  %vm86_vm1 = vcmask 23552   ;;  %v3719_v17 = vmov 0   ;;  %s4665_s0 = inlined_call_operand.vmem [shape: f32[5,5,3,128], index: 0, kind: input, shape index: {}]   ;;  %s4666_s1 = inlined_call_operand.vmem [shape: f32[4,16,3], index: 1, kind: input, shape index: {}]   ;;  %s4667_s2 = inlined_call_operand.vmem [shape: f32[16,1], index: 2, kind: input, shape index: {}]   ;;  %s4668_s4 = inlined_call_operand.vmem [shape: f32[32,1], index: 4, kind: input, shape index: {}]   ;;  %s4669_s6 = inlined_call_operand.vmem [shape: f32[64,1], index: 6, kind: input, shape index: {}]   ;;  %s4670_s8 = inlined_call_operand.vmem [shape: f32[9,1], index: 8, kind: input, shape index: {}]   ;;  %s4671_s3 = inlined_call_operand.vmem [shape: f32[32,16], index: 3, kind: input, shape index: {}]   ;;  %s4672_s5 = inlined_call_operand.vmem [shape: f32[64,32], index: 5, kind: input, shape index: {}]   ;;  %s4673_s7 = inlined_call_operand.vmem [shape: f32[9,256], index: 7, kind: input, shape index: {}]   ;;  %s4674_s9 = inlined_call_operand.vmem [shape: f32[9,128], index: 9, kind: output, shape index: {}]  }
   0x1   :  { %v3773_v0 = vld [vmem:[%s4665_s0 + $0xc] sm:$0x7]  ;;  %v3778_v1 = vld [vmem:[%s4665_s0 + $0x4] sm:$0x7]  ;;  %206 = vmatprep.mubr.f32.mxu0 %v4675_v2  ;;  %212 = vmatprep.mubr.f32.mxu1 %v4675_v2  ;;  %v3785_v3 = vld [vmem:[%s4666_s1 + $0x10] sm:$0xff]  ;;  %vm2849_vm2 = vcmask 130048  }
   0x2   :  { %3518 = vmatprep.subr.msk.mxu0 %vm93_vm0, %v3773_v0  ;;  %3712 = vmatprep.subr.msk.mxu1 %vm93_vm0, %v3773_v0  ;;  %v3794_v4 = vld [vmem:[%s4666_s1 + $0x18] sm:$0xff]  ;;  %v3799_v5 = vld [vmem:[%s4665_s0 + $0x34] sm:$0x7]  ;;  %v3495_v6 = vld [vmem:[%s4665_s0 + $0x10] sm:$0x7]  ;;  %vm3112_vm3 = vcmask 261120  }
   0x3   :  { %3519 = vmatpush1.msk.msra.mxu0 %vm93_vm0, %v3778_v1  ;;  %3713 = vmatpush1.msk.msra.mxu1 %vm93_vm0, %v3778_v1  ;;  %v3811_v7 = vld [vmem:[%s4665_s0 + $0x2c] sm:$0x7]  ;;  %v3493_v8 = vld [vmem:[%s4665_s0 + $0x8] sm:$0x7]  ;;  %v3831_v9 = vld [vmem:[%s4665_s0 + $0x38] sm:$0x7] }
   0x4   :  { %3520 = vmatmul.mubr.msk.f32.vlgmr.msra.gmra.mxu0 %vm86_vm1, %v3785_v3  ;;  %3521 = vmatmul.mubr.msk.f32.vlgmr.msra.gmra.mxu1 %vm86_vm1, %v3794_v4  ;;  %v3836_v10 = vld [vmem:[%s4665_s0 + $0x20] sm:$0x7]  ;;  %v3845_v11 = vld [vmem:[%s4665_s0 + $0x30] sm:$0x7]  ;;  %v3850_v12 = vld [vmem:[%s4665_s0 + $0x18] sm:$0x7] }
   0x5   :  { %3522 = vmatprep.subr.msk.mxu1 %vm93_vm0, %v3799_v5  ;;  %3526 = vmatprep.subr.msk.mxu0 %vm93_vm0, %v3495_v6  ;;  %v3865_v13 = vld [vmem:[%s4665_s0 + $0x48] sm:$0x7]  ;;  %v3870_v14 = vld [vmem:[%s4665_s0 + $0x24] sm:$0x7]  ;;  %v3885_v15 = vld [vmem:[%s4665_s0 + $0x40] sm:$0x7] }
   0x6   :  { %3523 = vmatpush1.msk.msra.mxu1 %vm93_vm0, %v3811_v7  ;;  %283 = vmatprep.mubr.f32.mxu1 %v4675_v2  ;;  %v3890_v16 = vld [vmem:[%s4665_s0 + $0x1c] sm:$0x7]  ;;  %v3899_v18 = vld [vmem:[%s4665_s0 + $0x4c] sm:$0x7]  ;;  %v3922_v20 = vld [vmem:[%s4665_s0 + $0x44] sm:$0x7] }
   0x7   :  { %3527 = vmatpush1.msk.msra.mxu0 %vm93_vm0, %v3493_v8  ;;  %360 = vmatprep.mubr.f32.mxu0 %v4675_v2  ;;  %v2722_v19 = vld [vmem:[%s4667_s2 + $0x8] sm:$0xff]  ;;  %v32_v21 = vld [vmem:[%s4665_s0] sm:$0x7]  ;;  %v3496_v27 = vld [vmem:[%s4665_s0 + $0x14] sm:$0x7] }
   0x8   :  { %3524 = vmatmul.mubr.msk.f32.vlgmr.msra.gmra.mxu1 %vm86_vm1, %v3785_v3  ;;  %3528 = vmatmul.mubr.msk.f32.vlgmr.msra.gmra.mxu0 %vm86_vm1, %v3785_v3  ;;  %v2721_v22 = vld [vmem:[%s4667_s2] sm:$0xff]  ;;  %v3957_v24 = vld [vmem:[%s4665_s0 + $0x28] sm:$0x7]  ;;  %v3071_v28 = vld [vmem:[%s4669_s6 + $0x38] sm:$0xff] }
   0x9   :  { %289 = vmatprep.mubr.f32.mxu1 %v4675_v2  ;;  %366 = vmatprep.mubr.f32.mxu0 %v4675_v2  ;;  %v3952_v23 = vld [vmem:[%s4666_s1] sm:$0xff]  ;;  %v3968_v25 = vld [vmem:[%s4666_s1 + $0x8] sm:$0xff]  ;;  %v3506_v29 = vld [vmem:[%s4665_s0 + $0x3c] sm:$0x7] }
   0xa   :  { %3530 = vmatprep.subr.msk.mxu1 %vm93_vm0, %v3831_v9  ;;  %3534 = vmatprep.subr.msk.mxu0 %vm93_vm0, %v3836_v10  ;;  %v2826_v26 = vld [vmem:[%s4668_s4 + $0x8] sm:$0xff]  ;;  %v3067_v31 = vld [vmem:[%s4669_s6 + $0x18] sm:$0xff]  ;;  %v3582_v32 = vld [vmem:[%s4666_s1 + $0x20] sm:$0xff] }
   0xb   :  { %3531 = vmatpush1.msk.msra.mxu1 %vm93_vm0, %v3845_v11  ;;  %3535 = vmatpush1.msk.msra.mxu0 %vm93_vm0, %v3850_v12  ;;  %v3069_v30 = vld [vmem:[%s4669_s6 + $0x28] sm:$0xff]  ;;  %v4093_v35 = vld [vmem:[%s4665_s0 + $0x58] sm:$0x7]  ;;  %v3399_v36 = vld [vmem:[%s4670_s8] sm:$0xff] }
   0xc   :  { %3525 = vmatmul.mubr.msk.f32.gmra.mxu1 %vm86_vm1, %v3794_v4  ;;  %3529 = vmatmul.mubr.msk.f32.gmra.mxu0 %vm86_vm1, %v3794_v4  ;;  %v4070_v33 = vld [vmem:[%s4666_s1 + $0x28] sm:$0xff]  ;;  %v3511_v37 = vld [vmem:[%s4665_s0 + $0x50] sm:$0x7]  ;;  %v3514_v38 = vld [vmem:[%s4665_s0 + $0x5c] sm:$0x7] }
   0xd   :  { %437 = vmatprep.mubr.f32.mxu1 %v4675_v2  ;;  %514 = vmatprep.mubr.f32.mxu0 %v4675_v2  ;;  %v3065_v34 = vld [vmem:[%s4669_s6 + $0x8] sm:$0xff]  ;;  %v3512_v39 = vld [vmem:[%s4665_s0 + $0x54] sm:$0x7]  ;;  %v3617_v41 = vld [vmem:[%s4666_s1 + $0x38] sm:$0xff] }
   0xe   :  { %3538 = vmatprep.subr.msk.mxu1 %vm93_vm0, %v3865_v13  ;;  %3542 = vmatprep.subr.msk.mxu0 %vm93_vm0, %v3870_v14  ;;  %v3616_v40 = vld [vmem:[%s4666_s1 + $0x30] sm:$0xff]  ;;  %v3515_v42 = vld [vmem:[%s4665_s0 + $0x60] sm:$0x7] }
   0xf   :  { %3716 = vset.pattern.permute.xlu0 %v3719_v17  ;;  %3717 = vset.pattern.permute.xlu1 %v3719_v17 }
  0x10   :  { %3532 = vmatmul.mubr.msk.f32.vlgmr.msra.gmra.mxu1 %vm86_vm1, %v3785_v3  ;;  %3536 = vmatmul.mubr.msk.f32.vlgmr.msra.gmra.mxu0 %vm86_vm1, %v3785_v3 }
  0x11   :  { %443 = vmatprep.mubr.f32.mxu1 %v4675_v2  ;;  %520 = vmatprep.mubr.f32.mxu0 %v4675_v2 }
  0x12   :  { %3539 = vmatpush1.msk.msra.mxu1 %vm93_vm0, %v3885_v15  ;;  %3543 = vmatpush1.msk.msra.mxu0 %vm93_vm0, %v3890_v16 }
  0x13   :  { %3546 = vmatprep.subr.msk.mxu1 %vm93_vm0, %v3899_v18  ;;  %3550 = vmatprep.subr.msk.mxu0 %vm93_vm0, %v3493_v8 }
  0x14   :  { %3533 = vmatmul.mubr.msk.f32.gmra.mxu1 %vm86_vm1, %v3794_v4  ;;  %3537 = vmatmul.mubr.msk.f32.gmra.mxu0 %vm86_vm1, %v3794_v4 }
  0x15   :  { %591 = vmatprep.mubr.f32.mxu1 %v4675_v2  ;;  %668 = vmatprep.mubr.f32.mxu0 %v4675_v2 }
  0x16   :  { %2730 = vperm.xlu0 %3716, %v2722_v19  }
  0x18   :  { %3540 = vmatmul.mubr.msk.f32.vlgmr.msra.gmra.mxu1 %vm86_vm1, %v3785_v3  ;;  %3544 = vmatmul.mubr.msk.f32.vlgmr.msra.gmra.mxu0 %vm86_vm1, %v3785_v3 }
  0x19   :  { %597 = vmatprep.mubr.f32.mxu1 %v4675_v2  ;;  %674 = vmatprep.mubr.f32.mxu0 %v4675_v2 }
  0x1a   :  { %3547 = vmatpush1.msk.msra.mxu1 %vm93_vm0, %v3922_v20  ;;  %3551 = vmatpush1.msk.msra.mxu0 %vm93_vm0, %v32_v21 }
  0x1b   :  { %3554 = vmatprep.subr.msk.mxu1 %vm93_vm0, %v3845_v11  ;;  %3558 = vmatprep.subr.msk.mxu0 %vm93_vm0, %v3773_v0 }
  0x1c   :  { %3541 = vmatmul.mubr.msk.f32.gmra.mxu1 %vm86_vm1, %v3794_v4  ;;  %3545 = vmatmul.mubr.msk.f32.gmra.mxu0 %vm86_vm1, %v3794_v4 }
  0x1d   :  { %745 = vmatprep.mubr.f32.mxu1 %v4675_v2  ;;  %840 = vmatprep.mubr.f32.mxu0 %v4675_v2 }
  0x1e   :  { %2725 = vperm.xlu0 %3716, %v2721_v22   ;;  %v2825_v22 = vld [vmem:[%s4668_s4] sm:$0xff] }
  0x20   :  { %3548 = vmatmul.mubr.msk.f32.vlgmr.msra.gmra.mxu1 %vm86_vm1, %v3785_v3  ;;  %3552 = vmatmul.mubr.msk.f32.vlgmr.msra.gmra.mxu0 %vm86_vm1, %v3952_v23 }
  0x21   :  { %751 = vmatprep.mubr.f32.mxu1 %v4675_v2  ;;  %846 = vmatprep.mubr.f32.mxu0 %v4675_v2 }
  0x22   :  { %3555 = vmatpush1.msk.msra.mxu1 %vm93_vm0, %v3957_v24  ;;  %3559 = vmatpush1.msk.msra.mxu0 %vm93_vm0, %v3778_v1 }
  0x23   :  { %3562 = vmatprep.subr.msk.mxu1 %vm93_vm0, %v3799_v5  ;;  %3566 = vmatprep.subr.msk.mxu0 %vm93_vm0, %v3890_v16 }
  0x24   :  { %3549 = vmatmul.mubr.msk.f32.gmra.mxu1 %vm86_vm1, %v3794_v4  ;;  %3553 = vmatmul.mubr.msk.f32.gmra.mxu0 %vm86_vm1, %v3968_v25 }
  0x25   :  { %917 = vmatprep.mubr.f32.mxu1 %v4675_v2  ;;  %994 = vmatprep.mubr.f32.mxu0 %v4675_v2 }
  0x26   :  { %2836 = vperm.xlu0 %3716, %v2826_v26  }
  0x28   :  { %3556 = vmatmul.mubr.msk.f32.vlgmr.msra.gmra.mxu1 %vm86_vm1, %v3952_v23  ;;  %3560 = vmatmul.mubr.msk.f32.vlgmr.msra.gmra.mxu0 %vm86_vm1, %v3952_v23 }
  0x29   :  { %923 = vmatprep.mubr.f32.mxu1 %v4675_v2  ;;  %1000 = vmatprep.mubr.f32.mxu0 %v4675_v2 }
  0x2a   :  { %3563 = vmatpush1.msk.msra.mxu1 %vm93_vm0, %v3811_v7  ;;  %3567 = vmatpush1.msk.msra.mxu0 %vm93_vm0, %v3496_v27 }
  0x2b   :  { %3570 = vmatprep.subr.msk.mxu1 %vm93_vm0, %v3922_v20  ;;  %3574 = vmatprep.subr.msk.mxu0 %vm93_vm0, %v3836_v10 }
  0x2c   :  { %3557 = vmatmul.mubr.msk.f32.gmra.mxu1 %vm86_vm1, %v3968_v25  ;;  %3561 = vmatmul.mubr.msk.f32.gmra.mxu0 %vm86_vm1, %v3968_v25 }
  0x2d   :  { %1071 = vmatprep.mubr.f32.mxu1 %v4675_v2  ;;  %1148 = vmatprep.mubr.f32.mxu0 %v4675_v2 }
  0x2e   :  { %3109 = vperm.xlu0 %3716, %v3071_v28  }
  0x30   :  { %3564 = vmatmul.mubr.msk.f32.vlgmr.msra.gmra.mxu1 %vm86_vm1, %v3952_v23  ;;  %3568 = vmatmul.mubr.msk.f32.vlgmr.msra.gmra.mxu0 %vm86_vm1, %v3952_v23 }
  0x31   :  { %1077 = vmatprep.mubr.f32.mxu1 %v4675_v2  ;;  %1154 = vmatprep.mubr.f32.mxu0 %v4675_v2 }
  0x32   :  { %3571 = vmatpush1.msk.msra.mxu1 %vm93_vm0, %v3506_v29  ;;  %3575 = vmatpush1.msk.msra.mxu0 %vm93_vm0, %v3850_v12 }
  0x33   :  { %3578 = vmatprep.subr.msk.mxu1 %vm93_vm0, %v3865_v13  ;;  %3584 = vmatprep.subr.msk.mxu0 %vm93_vm0, %v3890_v16 }
  0x34   :  { %3565 = vmatmul.mubr.msk.f32.gmra.mxu1 %vm86_vm1, %v3968_v25  ;;  %3569 = vmatmul.mubr.msk.f32.gmra.mxu0 %vm86_vm1, %v3968_v25 }
  0x35   :  { %1225 = vmatprep.mubr.f32.mxu1 %v4675_v2  ;;  %1302 = vmatprep.mubr.f32.mxu0 %v4675_v2 }
  0x36   :  { %3099 = vperm.xlu0 %3716, %v3069_v30  }
  0x38   :  { %3572 = vmatmul.mubr.msk.f32.vlgmr.msra.gmra.mxu1 %vm86_vm1, %v3952_v23  ;;  %3576 = vmatmul.mubr.msk.f32.vlgmr.msra.gmra.mxu0 %vm86_vm1, %v3952_v23 }
  0x39   :  { %1231 = vmatprep.mubr.f32.mxu1 %v4675_v2  ;;  %1308 = vmatprep.mubr.f32.mxu0 %v4675_v2 }
  0x3a   :  { %3579 = vmatpush1.msk.msra.mxu1 %vm93_vm0, %v3885_v15  ;;  %3585 = vmatpush1.msk.msra.mxu0 %vm93_vm0, %v3496_v27 }
  0x3b   :  { %3588 = vmatprep.subr.msk.mxu1 %vm93_vm0, %v3922_v20  ;;  %3592 = vmatprep.subr.msk.mxu0 %vm93_vm0, %v3836_v10 }
  0x3c   :  { %3573 = vmatmul.mubr.msk.f32.gmra.mxu1 %vm86_vm1, %v3968_v25  ;;  %3577 = vmatmul.mubr.msk.f32.gmra.mxu0 %vm86_vm1, %v3968_v25 }
  0x3d   :  { %1379 = vmatprep.mubr.f32.mxu1 %v4675_v2  ;;  %1477 = vmatprep.mubr.f32.mxu0 %v4675_v2 }
  0x3e   :  { %3089 = vperm.xlu0 %3716, %v3067_v31   ;;  %v3070_v31 = vld [vmem:[%s4669_s6 + $0x30] sm:$0xff] }
  0x40   :  { %3580 = vmatmul.mubr.msk.f32.vlgmr.msra.gmra.mxu1 %vm86_vm1, %v3952_v23  ;;  %3586 = vmatmul.mubr.msk.f32.vlgmr.msra.gmra.mxu0 %vm86_vm1, %v3582_v32 }
  0x41   :  { %1385 = vmatprep.mubr.f32.mxu1 %v4675_v2  ;;  %1483 = vmatprep.mubr.f32.mxu0 %v4675_v2 }
  0x42   :  { %3589 = vmatpush1.msk.msra.mxu1 %vm93_vm0, %v3506_v29  ;;  %3593 = vmatpush1.msk.msra.mxu0 %vm93_vm0, %v3850_v12 }
  0x43   :  { %3596 = vmatprep.subr.msk.mxu1 %vm93_vm0, %v3865_v13  ;;  %3600 = vmatprep.subr.msk.mxu0 %vm93_vm0, %v3845_v11 }
  0x44   :  { %3581 = vmatmul.mubr.msk.f32.gmra.mxu1 %vm86_vm1, %v3968_v25  ;;  %3587 = vmatmul.mubr.msk.f32.gmra.mxu0 %vm86_vm1, %v4070_v33 }
  0x45   :  { %1554 = vmatprep.mubr.f32.mxu1 %v4675_v2  ;;  %1631 = vmatprep.mubr.f32.mxu0 %v4675_v2 }
  0x46   :  { %3079 = vperm.xlu0 %3716, %v3065_v34  }
  0x48   :  { %3590 = vmatmul.mubr.msk.f32.vlgmr.msra.gmra.mxu1 %vm86_vm1, %v3582_v32  ;;  %3594 = vmatmul.mubr.msk.f32.vlgmr.msra.gmra.mxu0 %vm86_vm1, %v3582_v32 }
  0x49   :  { %1560 = vmatprep.mubr.f32.mxu1 %v4675_v2  ;;  %1637 = vmatprep.mubr.f32.mxu0 %v4675_v2 }
  0x4a   :  { %3597 = vmatpush1.msk.msra.mxu1 %vm93_vm0, %v3885_v15  ;;  %3601 = vmatpush1.msk.msra.mxu0 %vm93_vm0, %v3957_v24 }
  0x4b   :  { %3604 = vmatprep.subr.msk.mxu1 %vm93_vm0, %v4093_v35  ;;  %3608 = vmatprep.subr.msk.mxu0 %vm93_vm0, %v3799_v5 }
  0x4c   :  { %3591 = vmatmul.mubr.msk.f32.gmra.mxu1 %vm86_vm1, %v4070_v33  ;;  %3595 = vmatmul.mubr.msk.f32.gmra.mxu0 %vm86_vm1, %v4070_v33 }
  0x4d   :  { %1708 = vmatprep.mubr.f32.mxu1 %v4675_v2  ;;  %1785 = vmatprep.mubr.f32.mxu0 %v4675_v2 }
  0x4e   :  { %3403 = vperm.xlu0 %3716, %v3399_v36  }
  0x50   :  { %3598 = vmatmul.mubr.msk.f32.vlgmr.msra.gmra.mxu1 %vm86_vm1, %v3582_v32  ;;  %3602 = vmatmul.mubr.msk.f32.vlgmr.msra.gmra.mxu0 %vm86_vm1, %v3582_v32 }
  0x51   :  { %1714 = vmatprep.mubr.f32.mxu1 %v4675_v2  ;;  %1791 = vmatprep.mubr.f32.mxu0 %v4675_v2 }
  0x52   :  { %3605 = vmatpush1.msk.msra.mxu1 %vm93_vm0, %v3511_v37  ;;  %3609 = vmatpush1.msk.msra.mxu0 %vm93_vm0, %v3811_v7 }
  0x53   :  { %3612 = vmatprep.subr.msk.mxu1 %vm93_vm0, %v3514_v38  ;;  %3618 = vmatprep.subr.msk.mxu0 %vm93_vm0, %v3836_v10 }
  0x54   :  { %3599 = vmatmul.mubr.msk.f32.gmra.mxu1 %vm86_vm1, %v4070_v33  ;;  %3603 = vmatmul.mubr.msk.f32.gmra.mxu0 %vm86_vm1, %v4070_v33 }
  0x55   :  { %1862 = vmatprep.mubr.f32.mxu1 %v4675_v2  ;;  %1939 = vmatprep.mubr.f32.mxu0 %v4675_v2 }
  0x58   :  { %3606 = vmatmul.mubr.msk.f32.vlgmr.msra.gmra.mxu1 %vm86_vm1, %v3582_v32  ;;  %3610 = vmatmul.mubr.msk.f32.vlgmr.msra.gmra.mxu0 %vm86_vm1, %v3582_v32 }
  0x59   :  { %1868 = vmatprep.mubr.f32.mxu1 %v4675_v2  ;;  %1945 = vmatprep.mubr.f32.mxu0 %v4675_v2 }
  0x5a   :  { %3613 = vmatpush1.msk.msra.mxu1 %vm93_vm0, %v3512_v39  ;;  %3619 = vmatpush1.msk.msra.mxu0 %vm93_vm0, %v3850_v12 }
  0x5b   :  { %3622 = vmatprep.subr.msk.mxu1 %vm93_vm0, %v3865_v13  ;;  %3626 = vmatprep.subr.msk.mxu0 %vm93_vm0, %v3870_v14 }
  0x5c   :  { %3607 = vmatmul.mubr.msk.f32.gmra.mxu1 %vm86_vm1, %v4070_v33  ;;  %3611 = vmatmul.mubr.msk.f32.gmra.mxu0 %vm86_vm1, %v4070_v33 }
  0x5d   :  { %2016 = vmatprep.mubr.f32.mxu1 %v4675_v2  ;;  %2137 = vmatprep.mubr.f32.mxu0 %v4675_v2 }
  0x60   :  { %3614 = vmatmul.mubr.msk.f32.vlgmr.msra.gmra.mxu1 %vm86_vm1, %v3582_v32  ;;  %3620 = vmatmul.mubr.msk.f32.vlgmr.msra.gmra.mxu0 %vm86_vm1, %v3616_v40 }
  0x61   :  { %2022 = vmatprep.mubr.f32.mxu1 %v4675_v2  ;;  %2143 = vmatprep.mubr.f32.mxu0 %v4675_v2 }
  0x62   :  { %3623 = vmatpush1.msk.msra.mxu1 %vm93_vm0, %v3885_v15  ;;  %3627 = vmatpush1.msk.msra.mxu0 %vm93_vm0, %v3890_v16  ;;  %v2827_v15 = vld [vmem:[%s4668_s4 + $0x10] sm:$0xff] }
  0x63   :  { %3630 = vmatprep.subr.msk.mxu1 %vm93_vm0, %v3899_v18  ;;  %3634 = vmatprep.subr.msk.mxu0 %vm93_vm0, %v3799_v5 }
  0x64   :  { %3615 = vmatmul.mubr.msk.f32.gmra.mxu1 %vm86_vm1, %v4070_v33  ;;  %3621 = vmatmul.mubr.msk.f32.gmra.mxu0 %vm86_vm1, %v3617_v41 }
  0x65   :  { %2214 = vmatprep.mubr.f32.mxu1 %v4675_v2  ;;  %2291 = vmatprep.mubr.f32.mxu0 %v4675_v2 }
  0x68   :  { %3624 = vmatmul.mubr.msk.f32.vlgmr.msra.gmra.mxu1 %vm86_vm1, %v3616_v40  ;;  %3628 = vmatmul.mubr.msk.f32.vlgmr.msra.gmra.mxu0 %vm86_vm1, %v3616_v40 }
  0x69   :  { %2220 = vmatprep.mubr.f32.mxu1 %v4675_v2  ;;  %2297 = vmatprep.mubr.f32.mxu0 %v4675_v2 }
  0x6a   :  { %3631 = vmatpush1.msk.msra.mxu1 %vm93_vm0, %v3922_v20  ;;  %3635 = vmatpush1.msk.msra.mxu0 %vm93_vm0, %v3811_v7 }
  0x6b   :  { %3638 = vmatprep.subr.msk.mxu1 %vm93_vm0, %v3514_v38  ;;  %3642 = vmatprep.subr.msk.mxu0 %vm93_vm0, %v3831_v9 }
  0x6c   :  { %3625 = vmatmul.mubr.msk.f32.gmra.mxu1 %vm86_vm1, %v3617_v41  ;;  %3629 = vmatmul.mubr.msk.f32.gmra.mxu0 %vm86_vm1, %v3617_v41 }
  0x6d   :  { %2368 = vmatprep.mubr.f32.mxu1 %v4675_v2  ;;  %2445 = vmatprep.mubr.f32.mxu0 %v4675_v2 }
  0x70   :  { %3632 = vmatmul.mubr.msk.f32.vlgmr.msra.gmra.mxu1 %vm86_vm1, %v3616_v40  ;;  %3636 = vmatmul.mubr.msk.f32.vlgmr.msra.gmra.mxu0 %vm86_vm1, %v3616_v40 }
  0x71   :  { %2374 = vmatprep.mubr.f32.mxu1 %v4675_v2  ;;  %2451 = vmatprep.mubr.f32.mxu0 %v4675_v2 }
  0x72   :  { %3639 = vmatpush1.msk.msra.mxu1 %vm93_vm0, %v3512_v39  ;;  %3643 = vmatpush1.msk.msra.mxu0 %vm93_vm0, %v3845_v11  ;;  %v2828_v11 = vld [vmem:[%s4668_s4 + $0x18] sm:$0xff] }
  0x73   :  { %3646 = vmatprep.subr.msk.mxu1 %vm93_vm0, %v3515_v42  ;;  %2846 = vperm.xlu1 %3717, %v2828_v11  }
  0x74   :  { %3633 = vmatmul.mubr.msk.f32.gmra.mxu1 %vm86_vm1, %v3617_v41  ;;  %3637 = vmatmul.mubr.msk.f32.gmra.mxu0 %vm86_vm1, %v3617_v41 }
  0x75   :  { %2522 = vmatprep.mubr.f32.mxu1 %v4675_v2  ;;  %2599 = vmatprep.mubr.f32.mxu0 %v4675_v2 }
  0x77   :  { %2841 = vperm.xlu1 %3717, %v2827_v15  }
  0x78   :  { %3640 = vmatmul.mubr.msk.f32.vlgmr.msra.gmra.mxu1 %vm86_vm1, %v3616_v40  ;;  %3644 = vmatmul.mubr.msk.f32.vlgmr.msra.gmra.mxu0 %vm86_vm1, %v3616_v40 }
  0x79   :  { %2528 = vmatprep.mubr.f32.mxu1 %v4675_v2  ;;  %2605 = vmatprep.mubr.f32.mxu0 %v4675_v2 }
  0x7a   :  { %3647 = vmatpush1.msk.msra.mxu1 %vm93_vm0, %v4093_v35 }
  0x7b   :  { %2831 = vperm.xlu1 %3717, %v2825_v22  }
  0x7c   :  { %3641 = vmatmul.mubr.msk.f32.gmra.mxu1 %vm86_vm1, %v3617_v41  ;;  %3645 = vmatmul.mubr.msk.f32.gmra.mxu0 %vm86_vm1, %v3617_v41 }
  0x7d   :  { %2676 = vmatprep.mubr.f32.mxu1 %v4675_v2  ;;  %2926 = vmatprep.mubr.f32.mxu0 %v4675_v2 }
  0x7f   :  { %3104 = vperm.xlu1 %3717, %v3070_v31  }
  0x80   :  { %3648 = vmatmul.mubr.msk.f32.vlgmr.msra.gmra.mxu1 %vm86_vm1, %v3616_v40  ;;  %v3068_v40 = vld [vmem:[%s4669_s6 + $0x20] sm:$0xff] }
  0x81   :  { %2682 = vmatprep.mubr.f32.mxu1 %v4675_v2 }
  0x83   :  { %3094 = vperm.xlu1 %3717, %v3068_v40  }
  0x84   :  { %3649 = vmatmul.mubr.msk.f32.gmra.mxu1 %vm86_vm1, %v3617_v41 }
  0x85   :  { %3015 = vmatprep.mubr.f32.mxu1 %v4675_v2 }
  0xc4   :  { %v208_v43 = vpop.f32.mrf.mxu0  ;;  %v214_v44 = vpop.f32.mrf.mxu1 }
  0xc6   :  { %v210_v45 = vpop.f32.mrf.mxu0  ;;  %v216_v46 = vpop.f32.mrf.mxu1 }
  0xc8   :  { %v285_v47 = vpop.f32.mrf.mxu1  ;;  %v362_v48 = vpop.f32.mrf.mxu0 }
  0xca   :  { %v287_v49 = vpop.f32.mrf.mxu1  ;;  %v364_v50 = vpop.f32.mrf.mxu0 }
  0xcc   :  { %v291_v51 = vpop.f32.mrf.mxu1  ;;  %v368_v52 = vpop.f32.mrf.mxu0 }
  0xce   :  { %v293_v53 = vpop.f32.mrf.mxu1  ;;  %v370_v54 = vpop.f32.mrf.mxu0 }
  0xd0   :  { %v439_v55 = vpop.f32.mrf.mxu1  ;;  %v516_v56 = vpop.f32.mrf.mxu0 }
  0xd2   :  { %v441_v57 = vpop.f32.mrf.mxu1  ;;  %v518_v58 = vpop.f32.mrf.mxu0 }
  0xd4   :  { %v445_v59 = vpop.f32.mrf.mxu1  ;;  %v522_v60 = vpop.f32.mrf.mxu0 }
  0xd6   :  { %v4223_v61 = vpop.f32.mrf.mxu1  ;;  %v4225_v62 = vpop.f32.mrf.mxu0 }
  0xd8   :  { %v4227_v63 = vpop.f32.mrf.mxu1  ;;  %v4229_v0 = vpop.f32.mrf.mxu0 }
  0xda   :  { %v4231_v1 = vpop.f32.mrf.mxu1  ;;  %v4233_v3 = vpop.f32.mrf.mxu0 }
  0xdc   :  { %v4235_v4 = vpop.f32.mrf.mxu1  ;;  %v4237_v5 = vpop.f32.mrf.mxu0 }
  0xde   :  { %v4239_v6 = vpop.f32.mrf.mxu1  ;;  %v4241_v7 = vpop.f32.mrf.mxu0 }
  0xe0   :  { %v4243_v8 = vpop.f32.mrf.mxu1  ;;  %v842_v9 = vpop.f32.mrf.mxu0 }
  0xe1   :  { %v4245_v10 = vadd.f32 %v842_v9, %v208_v43 }
  0xe2   :  { %v4250_v12 = vpop.f32.mrf.mxu1  ;;  %v844_v13 = vpop.f32.mrf.mxu0 }
  0xe3   :  { %v4252_v14 = vadd.f32 %v844_v13, %v210_v45 }
  0xe4   :  { %v4257_v16 = vpop.f32.mrf.mxu1  ;;  %v848_v17 = vpop.f32.mrf.mxu0 }
  0xe5   :  { %v4259_v18 = vadd.f32 %v848_v17, %v214_v44  ;;  %v3400_v17 = vld [vmem:[%s4670_s8 + $0x8] sm:$0x1] }
  0xe6   :  { %v4261_v19 = vpop.f32.mrf.mxu1  ;;  %v850_v20 = vpop.f32.mrf.mxu0 }
  0xe7   :  { %v4263_v21 = vadd.f32 %v850_v20, %v216_v46 }
  0xe8   :  { %v919_v23 = vpop.f32.mrf.mxu1  ;;  %v996_v24 = vpop.f32.mrf.mxu0 }
  0xe9   :  { %v4268_v25 = vadd.f32 %v919_v23, %v285_v47  ;;  %v4270_v26 = vadd.f32 %v996_v24, %v362_v48 }
  0xea   :  { %v921_v27 = vpop.f32.mrf.mxu1  ;;  %v998_v28 = vpop.f32.mrf.mxu0 }
  0xeb   :  { %v4272_v29 = vadd.f32 %v921_v27, %v287_v49  ;;  %v4274_v30 = vadd.f32 %v998_v28, %v364_v50  ;;  %v3066_v49 = vld [vmem:[%s4669_s6 + $0x10] sm:$0xff] }
  0xec   :  { %v925_v32 = vpop.f32.mrf.mxu1  ;;  %v1002_v33 = vpop.f32.mrf.mxu0  ;;  %3084 = vperm.xlu1 %3717, %v3066_v49  }
  0xed   :  { %v4279_v34 = vadd.f32 %v925_v32, %v291_v51  ;;  %v4281_v35 = vadd.f32 %v1002_v33, %v368_v52 }
  0xee   :  { %v927_v36 = vpop.f32.mrf.mxu1  ;;  %v1004_v37 = vpop.f32.mrf.mxu0 }
  0xef   :  { %v4283_v38 = vadd.f32 %v927_v36, %v293_v53  ;;  %v4285_v39 = vadd.f32 %v1004_v37, %v370_v54 }
  0xf0   :  { %v1073_v41 = vpop.f32.mrf.mxu1  ;;  %v1150_v42 = vpop.f32.mrf.mxu0 }
  0xf1   :  { %v4290_v43 = vadd.f32 %v1073_v41, %v439_v55  ;;  %v4292_v44 = vadd.f32 %v1150_v42, %v516_v56 }
  0xf2   :  { %v1075_v45 = vpop.f32.mrf.mxu1  ;;  %v1152_v46 = vpop.f32.mrf.mxu0 }
  0xf3   :  { %v4294_v47 = vadd.f32 %v1075_v45, %v441_v57  ;;  %v4296_v48 = vadd.f32 %v1152_v46, %v518_v58  ;;  %v3064_v58 = vld [vmem:[%s4669_s6] sm:$0xff] }
  0xf4   :  { %v1079_v50 = vpop.f32.mrf.mxu1  ;;  %v1156_v51 = vpop.f32.mrf.mxu0  ;;  %3074 = vperm.xlu1 %3717, %v3064_v58  }
  0xf5   :  { %v4301_v52 = vadd.f32 %v1079_v50, %v445_v59  ;;  %v4303_v53 = vadd.f32 %v1156_v51, %v522_v60 }
  0xf6   :  { %v1081_v54 = vpop.f32.mrf.mxu1  ;;  %v1158_v55 = vpop.f32.mrf.mxu0 }
  0xf7   :  { %v4306_v56 = vadd.f32 %v1081_v54, %v4223_v61  ;;  %v4309_v57 = vadd.f32 %v1158_v55, %v4225_v62 }
  0xf8   :  { %v1227_v9 = vpop.f32.mrf.mxu1  ;;  %v1304_v11 = vpop.f32.mrf.mxu0  ;;  %3408 = vperm.xlu1 %3717, %v3400_v17  }
  0xf9   :  { %v4315_v59 = vadd.f32 %v1227_v9, %v4227_v63  ;;  %v4318_v60 = vadd.f32 %v1304_v11, %v4229_v0 }
  0xfa   :  { %v1229_v13 = vpop.f32.mrf.mxu1  ;;  %v1306_v15 = vpop.f32.mrf.mxu0 }
  0xfb   :  { %4678 = vst [vmem:[#allocation2_spill] sm:$0xff] %v4318_v60  ;;  %v4321_v61 = vadd.f32 %v1229_v13, %v4231_v1  ;;  %v4324_v62 = vadd.f32 %v1306_v15, %v4233_v3 }
  0xfc   :  { %v1233_v20 = vpop.f32.mrf.mxu1  ;;  %v1310_v22 = vpop.f32.mrf.mxu0 }
  0xfd   :  { %4679 = vst [vmem:[#allocation3_spill] sm:$0xff] %v4321_v61  ;;  %4680 = vst [vmem:[#allocation4_spill] sm:$0xff] %v4324_v62  ;;  %v4330_v63 = vadd.f32 %v1233_v20, %v4235_v4  ;;  %v4357_v60 = vadd.f32 %v1310_v22, %v4237_v5 }
  0xfe   :  { %v1235_v0 = vpop.f32.mrf.mxu1  ;;  %v1312_v23 = vpop.f32.mrf.mxu0 }
  0xff   :  { %4681 = vst [vmem:[#allocation5_spill] sm:$0xff] %v4330_v63  ;;  %v4333_v24 = vadd.f32 %v1235_v0, %v4239_v6 }
 0x100   :  { %v1381_v1 = vpop.f32.mrf.mxu1  ;;  %v1479_v27 = vpop.f32.mrf.mxu0 }
 0x101   :  { %4682 = vst [vmem:[#allocation6_spill] sm:$0xff] %v4333_v24  ;;  %v4336_v3 = vadd.f32 %v1381_v1, %v4243_v8  ;;  %v2029_v61 = vadd.f32 %v1479_v27, %v4245_v10 }
 0x102   :  { %v1383_v28 = vpop.f32.mrf.mxu1  ;;  %v1481_v31 = vpop.f32.mrf.mxu0 }
 0x103   :  { %4683 = vst [vmem:[#allocation7_spill] sm:$0xff] %v4336_v3  ;;  %v4339_v32 = vadd.f32 %v1383_v28, %v4250_v12 }
 0x104   :  { %v1387_v33 = vpop.f32.mrf.mxu1  ;;  %v1485_v36 = vpop.f32.mrf.mxu0 }
 0x105   :  { %4684 = vst [vmem:[#allocation8_spill] sm:$0xff] %v4339_v32  ;;  %v4349_v32 = vpop.permute.xlu0 %2730 }
 0x106   :  { %v1389_v4 = vpop.f32.mrf.mxu1  ;;  %v1487_v37 = vpop.f32.mrf.mxu0  ;;  %4689 = vst [vmem:[#allocation13_spill] sm:$0xff] %v4349_v32  ;;  %v4366_v32 = vadd.f32 %v1387_v33, %v4257_v16 }
 0x107   :  { %v2046_v5 = vadd.f32 %v1487_v37, %v4263_v21 }
 0x108   :  { %v1556_v40 = vpop.f32.mrf.mxu1  ;;  %v1633_v41 = vpop.f32.mrf.mxu0 }
 0x109   :  { %v4372_v27 = vpop.permute.xlu0 %2725 }
 0x10a   :  { %v1558_v42 = vpop.f32.mrf.mxu1  ;;  %v1635_v45 = vpop.f32.mrf.mxu0 }
 0x10b   :  { %v2032_v22 = vadd.f32 %v1558_v42, %v4272_v29 }
 0x10c   :  { %v1562_v6 = vpop.f32.mrf.mxu1  ;;  %v1639_v46 = vpop.f32.mrf.mxu0 }
 0x10e   :  { %v1564_v49 = vpop.f32.mrf.mxu1  ;;  %v1641_v50 = vpop.f32.mrf.mxu0 }
 0x10f   :  { %v2050_v21 = vadd.f32 %v1641_v50, %v4285_v39 }
 0x110   :  { %v1710_v51 = vpop.f32.mrf.mxu1  ;;  %v1787_v8 = vpop.f32.mrf.mxu0 }
 0x112   :  { %v1712_v54 = vpop.f32.mrf.mxu1  ;;  %v1789_v55 = vpop.f32.mrf.mxu0 }
 0x114   :  { %v1716_v58 = vpop.f32.mrf.mxu1  ;;  %v1793_v9 = vpop.f32.mrf.mxu0 }
 0x115   :  { %v4396_v39 = vadd.f32 %v1793_v9, %v4303_v53 }
 0x116   :  { %v1718_v12 = vpop.f32.mrf.mxu1  ;;  %v1795_v11 = vpop.f32.mrf.mxu0 }
 0x118   :  { %v1864_v13 = vpop.f32.mrf.mxu1  ;;  %v1941_v15 = vpop.f32.mrf.mxu0 }
 0x11a   :  { %v1866_v17 = vpop.f32.mrf.mxu1  ;;  %v1943_v20 = vpop.f32.mrf.mxu0 }
 0x11c   :  { %v4341_v0 = vpop.f32.mrf.mxu1  ;;  %v4343_v1 = vpop.f32.mrf.mxu0 }
 0x11d   :  { %4685 = vst [vmem:[#allocation9_spill] sm:$0xff] %v4341_v0  ;;  %4686 = vst [vmem:[#allocation10_spill] sm:$0xff] %v4343_v1  ;;  %v4360_v0 = vadd.f32 %v1312_v23, %v4241_v7  ;;  %v2031_v7 = vadd.f32 %v1556_v40, %v4268_v25  ;;  %v2035_v25 = vadd.f32 %v1710_v51, %v4290_v43  ;;  %v4694_v51 = vld [vmem:[#allocation3_spill] sm:$0xff] }
 0x11e   :  { %v4345_v28 = vpop.f32.mrf.mxu1  ;;  %v4347_v2 = vpop.f32.mrf.mxu0  ;;  %v4399_v43 = vadd.f32 %v1718_v12, %v4306_v56  ;;  %v4404_v40 = vadd.f32 %v1795_v11, %v4309_v57 }
 0x11f   :  { %4687 = vst [vmem:[#allocation11_spill] sm:$0xff] %v4345_v28  ;;  %4688 = vst [vmem:[#allocation12_spill] sm:$0xff] %v4347_v2  ;;  %v2030_v28 = vadd.f32 %v1481_v31, %v4252_v14  ;;  %v2033_v14 = vadd.f32 %v1633_v41, %v4270_v26  ;;  %v2034_v31 = vadd.f32 %v1635_v45, %v4274_v30  ;;  %v4693_v45 = vld [vmem:[#allocation13_spill] sm:$0xff] }
 0x120   :  { %v4351_v3 = vpop.f32.mrf.mxu1  ;;  %v2139_v24 = vpop.f32.mrf.mxu0  ;;  %v4387_v26 = vadd.f32 %v1787_v8, %v4292_v44  ;;  %v4414_v8 = vadd.f32 %v1866_v17, %v4694_v51 }
 0x121   :  { %4690 = vst [vmem:[#allocation14_spill] sm:$0xff] %v4351_v3  ;;  %v2045_v3 = vadd.f32 %v1485_v36, %v4259_v18  ;;  %v2689_v10 = vadd.f32 %v2139_v24, %v2029_v61  ;;  %v2047_v18 = vadd.f32 %v1562_v6, %v4279_v34  ;;  %v2048_v24 = vadd.f32 %v1564_v49, %v4283_v38 }
 0x122   :  { %v4353_v63 = vpop.f32.mrf.mxu1  ;;  %v2141_v62 = vpop.f32.mrf.mxu0  ;;  %v2036_v36 = vadd.f32 %v1712_v54, %v4294_v47  ;;  %v2051_v38 = vadd.f32 %v1716_v58, %v4301_v52  ;;  %v4692_v52 = vld [vmem:[#allocation2_spill] sm:$0xff]  ;;  %v4695_v54 = vld [vmem:[#allocation4_spill] sm:$0xff] }
 0x123   :  { %4691 = vst [vmem:[#allocation15_spill] sm:$0xff] %v4353_v63  ;;  %v4370_v63 = vadd.f32 %v1389_v4, %v4261_v19  ;;  %v2049_v19 = vadd.f32 %v1639_v46, %v4281_v35  ;;  %v2690_v61 = vadd.f32 %v2141_v62, %v2030_v28  ;;  %v2733_v34 = vadd.f32 %v4372_v27, %v2689_v10 }
 0x124   :  { %v4363_v1 = vpop.f32.mrf.mxu1  ;;  %v2145_v2 = vpop.f32.mrf.mxu0  ;;  %v4392_v35 = vadd.f32 %v1789_v55, %v4296_v48  ;;  %v4407_v48 = vadd.f32 %v1864_v13, %v4315_v59  ;;  %v4410_v53 = vadd.f32 %v1941_v15, %v4692_v52  ;;  %v4417_v57 = vadd.f32 %v1943_v20, %v4695_v54 }
 0x125   :  { %v2705_v4 = vadd.f32 %v2145_v2, %v2045_v3  ;;  %v2734_v37 = vadd.f32 %v4372_v27, %v2690_v61  ;;  %v2765_v46 = vmax.f32 %v2733_v34, 0.0 }
 0x126   :  { %v4378_v23 = vpop.f32.mrf.mxu1  ;;  %v2147_v16 = vpop.f32.mrf.mxu0 }
 0x127   :  { %v2706_v47 = vadd.f32 %v2147_v16, %v2046_v5  ;;  %v2749_v6 = vadd.f32 %v4693_v45, %v2705_v4  ;;  %v2766_v12 = vmax.f32 %v2734_v37, 0.0 }
 0x128   :  { %v2216_v29 = vpop.f32.mrf.mxu1  ;;  %v2293_v33 = vpop.f32.mrf.mxu0 }
 0x129   :  { %v2693_v30 = vadd.f32 %v2293_v33, %v2033_v14  ;;  %v2691_v2 = vadd.f32 %v2216_v29, %v2031_v7  ;;  %v2750_v11 = vadd.f32 %v4693_v45, %v2706_v47  ;;  %v4696_v14 = vld [vmem:[#allocation5_spill] sm:$0xff] }
 0x12a   :  { %v2218_v44 = vpop.f32.mrf.mxu1  ;;  %v2295_v62 = vpop.f32.mrf.mxu0 }
 0x12b   :  { %v2737_v3 = vadd.f32 %v4372_v27, %v2693_v30  ;;  %v2694_v41 = vadd.f32 %v2295_v62, %v2034_v31  ;;  %v2692_v50 = vadd.f32 %v2218_v44, %v2032_v22  ;;  %v2735_v13 = vadd.f32 %v4372_v27, %v2691_v2  ;;  %v4697_v22 = vld [vmem:[#allocation9_spill] sm:$0xff] }
 0x12c   :  { %v2222_v56 = vpop.f32.mrf.mxu1  ;;  %v2299_v42 = vpop.f32.mrf.mxu0  ;;  %v4427_v16 = vadd.f32 %v4697_v22, %v4696_v14  ;;  %v2781_v31 = vmax.f32 %v2749_v6, 0.0  ;;  %v2782_v62 = vmax.f32 %v2750_v11, 0.0  ;;  %v4700_v11 = vld [vmem:[#allocation11_spill] sm:$0xff] }
 0x12d   :  { %v2769_v49 = vmax.f32 %v2737_v3, 0.0  ;;  %v2738_v59 = vadd.f32 %v4372_v27, %v2694_v41  ;;  %v2709_v55 = vadd.f32 %v2299_v42, %v2049_v19  ;;  %v2707_v10 = vadd.f32 %v2222_v56, %v2047_v18 }
 0x12e   :  { %v2224_v58 = vpop.f32.mrf.mxu1  ;;  %v2301_v9 = vpop.f32.mrf.mxu0  ;;  %v2736_v19 = vadd.f32 %v4372_v27, %v2692_v50  ;;  %v2767_v2 = vmax.f32 %v2735_v13, 0.0  ;;  %v4701_v13 = vld [vmem:[#allocation12_spill] sm:$0xff] }
 0x12f   :  { %v4422_v15 = vmax.f32 %v2765_v46, %v2769_v49  ;;  %v2770_v28 = vmax.f32 %v2738_v59, 0.0  ;;  %v2753_v17 = vadd.f32 %v4693_v45, %v2709_v55  ;;  %v2710_v5 = vadd.f32 %v2301_v9, %v2050_v21  ;;  %v4698_v21 = vld [vmem:[#allocation10_spill] sm:$0xff] }
 0x130   :  { %v2370_v7 = vpop.f32.mrf.mxu1  ;;  %v2447_v20 = vpop.f32.mrf.mxu0  ;;  %v2708_v4 = vadd.f32 %v2224_v58, %v2048_v24  ;;  %v2057_v44 = vadd.f32 %v4698_v21, %v4357_v60  ;;  %v2751_v3 = vadd.f32 %v4693_v45, %v2707_v10  ;;  %v2768_v24 = vmax.f32 %v2736_v19, 0.0  ;;  %v4702_v10 = vld [vmem:[#allocation7_spill] sm:$0xff] }
 0x131   :  { %v2695_v61 = vadd.f32 %v2370_v7, %v2035_v25  ;;  %v4430_v29 = vmax.f32 %v2766_v12, %v2770_v28  ;;  %v2785_v33 = vmax.f32 %v2753_v17, 0.0  ;;  %v2754_v30 = vadd.f32 %v4693_v45, %v2710_v5  ;;  %v4699_v12 = vld [vmem:[#allocation6_spill] sm:$0xff] }
 0x132   :  { %v2372_v18 = vpop.f32.mrf.mxu1  ;;  %v2449_v34 = vpop.f32.mrf.mxu0  ;;  %v2752_v49 = vadd.f32 %v4693_v45, %v2708_v4  ;;  %v2697_v50 = vadd.f32 %v2447_v20, %v4387_v26  ;;  %v2058_v28 = vadd.f32 %v4701_v13, %v4360_v0  ;;  %v4703_v17 = vld [vmem:[#allocation14_spill] sm:$0xff]  ;;  %v2783_v5 = vmax.f32 %v2751_v3, 0.0 }
 0x133   :  { %v2739_v37 = vadd.f32 %v4372_v27, %v2695_v61  ;;  %v2696_v47 = vadd.f32 %v2372_v18, %v2036_v36  ;;  %v4437_v52 = vmax.f32 %v2781_v31, %v2785_v33  ;;  %v2786_v25 = vmax.f32 %v2754_v30, 0.0 }
 0x134   :  { %v2376_v41 = vpop.f32.mrf.mxu1  ;;  %v2453_v56 = vpop.f32.mrf.mxu0  ;;  %v2698_v36 = vadd.f32 %v2449_v34, %v4392_v35  ;;  %v2043_v26 = vadd.f32 %v4703_v17, %v4702_v10  ;;  %v2741_v19 = vadd.f32 %v4372_v27, %v2697_v50 }
 0x135   :  { %v2771_v42 = vmax.f32 %v2739_v37, 0.0  ;;  %v2740_v6 = vadd.f32 %v4372_v27, %v2696_v47  ;;  %v2711_v46 = vadd.f32 %v2376_v41, %v2051_v38  ;;  %v4441_v60 = vmax.f32 %v2782_v62, %v2786_v25  ;;  %v4704_v62 = vld [vmem:[#allocation8_spill] sm:$0xff] }
 0x136   :  { %v2378_v51 = vpop.f32.mrf.mxu1  ;;  %v2455_v54 = vpop.f32.mrf.mxu0  ;;  %v2056_v38 = vadd.f32 %v4700_v11, %v4699_v12  ;;  %v2713_v22 = vadd.f32 %v2453_v56, %v4396_v39  ;;  %v2742_v61 = vadd.f32 %v4372_v27, %v2698_v36  ;;  %v4705_v39 = vld [vmem:[#allocation15_spill] sm:$0xff]  ;;  %v2059_v47 = vadd.f32 %v4363_v1, %v4366_v32 }
 0x137   :  { %v4445_v59 = vmax.f32 %v2767_v2, %v2771_v42  ;;  %v2772_v55 = vmax.f32 %v2740_v6, 0.0  ;;  %v2755_v58 = vadd.f32 %v4693_v45, %v2711_v46  ;;  %v2712_v9 = vadd.f32 %v2378_v51, %v4399_v43 }
 0x138   :  { %v2524_v35 = vpop.f32.mrf.mxu1  ;;  %v2601_v7 = vpop.f32.mrf.mxu0  ;;  %v2784_v43 = vmax.f32 %v2752_v49, 0.0  ;;  %v2714_v34 = vadd.f32 %v2455_v54, %v4404_v40  ;;  %v2044_v37 = vadd.f32 %v4705_v39, %v4704_v62  ;;  %v2060_v41 = vadd.f32 %v4378_v23, %v4370_v63 }
 0x139   :  { %v4455_v20 = vmax.f32 %v2768_v24, %v2772_v55  ;;  %v2787_v14 = vmax.f32 %v2755_v58, 0.0  ;;  %v2756_v31 = vadd.f32 %v4693_v45, %v2712_v9  ;;  %v2701_v0 = vadd.f32 %v2601_v7, %v4410_v53 }
 0x13a   :  { %v2526_v33 = vpop.f32.mrf.mxu1  ;;  %v2603_v4 = vpop.f32.mrf.mxu0  ;;  %v2699_v21 = vadd.f32 %v2524_v35, %v4407_v48  ;;  %v2757_v56 = vadd.f32 %v4693_v45, %v2713_v22  ;;  %v2773_v24 = vmax.f32 %v2741_v19, 0.0  ;;  %v2774_v49 = vmax.f32 %v2742_v61, 0.0 }
 0x13b   :  { %v4462_v30 = vmax.f32 %v2783_v5, %v2787_v14  ;;  %v2788_v18 = vmax.f32 %v2756_v31, 0.0  ;;  %v2745_v2 = vadd.f32 %v4372_v27, %v2701_v0  ;;  %v2702_v3 = vadd.f32 %v2603_v4, %v4417_v57 }
 0x13c   :  { %v2530_v53 = vpop.f32.mrf.mxu1  ;;  %v2607_v25 = vpop.f32.mrf.mxu0  ;;  %v2700_v48 = vadd.f32 %v2526_v33, %v4414_v8  ;;  %v2758_v57 = vadd.f32 %v4693_v45, %v2714_v34  ;;  %v2743_v50 = vadd.f32 %v4372_v27, %v2699_v21  ;;  %v2789_v55 = vmax.f32 %v2757_v56, 0.0  ;;  %v2822_v56 = vld [vmem:[%s4671_s3 + $0x8] sm:$0xff] }
 0x13d   :  { %v4475_v40 = vmax.f32 %v2784_v43, %v2788_v18  ;;  %v2777_v42 = vmax.f32 %v2745_v2, 0.0  ;;  %v2746_v6 = vadd.f32 %v4372_v27, %v2702_v3  ;;  %v2717_v32 = vadd.f32 %v2607_v25, %v2057_v44  ;;  %v2821_v25 = vld [vmem:[%s4671_s3] sm:$0xff] }
 0x13e   :  { %v2532_v1 = vpop.f32.mrf.mxu1  ;;  %v2609_v46 = vpop.f32.mrf.mxu0  ;;  %v2715_v51 = vadd.f32 %v2530_v53, %v4427_v16  ;;  %v2744_v58 = vadd.f32 %v4372_v27, %v2700_v48  ;;  %v2775_v7 = vmax.f32 %v2743_v50, 0.0 }
 0x13f   :  { %v2718_v36 = vadd.f32 %v2609_v46, %v2058_v28  ;;  %v2805_v63 = vmax.f32 %v2773_v24, %v2777_v42  ;;  %v2778_v23 = vmax.f32 %v2746_v6, 0.0  ;;  %v2761_v54 = vadd.f32 %v4693_v45, %v2717_v32  ;;  %v2847_v6 = vpop.permute.xlu1 %2846 }
 0x140   :  { %v2678_v8 = vpop.f32.mrf.mxu1  ;;  %v2716_v10 = vadd.f32 %v2532_v1, %v2056_v38  ;;  %v2790_v28 = vmax.f32 %v2758_v57, 0.0  ;;  %v2759_v14 = vadd.f32 %v4693_v45, %v2715_v51  ;;  %v2776_v0 = vmax.f32 %v2744_v58, 0.0 }
 0x141   :  { %v2762_v44 = vadd.f32 %v4693_v45, %v2718_v36  ;;  %v2703_v9 = vadd.f32 %v2678_v8, %v2043_v26  ;;  %v2813_v12 = vmax.f32 %v4422_v15, %v2805_v63  ;;  %v2806_v11 = vmax.f32 %v2774_v49, %v2778_v23 }
 0x142   :  { %v2793_v13 = vmax.f32 %v2761_v54, 0.0  ;;  %v2680_v17 = vpop.f32.mrf.mxu1  ;;  %v2760_v33 = vadd.f32 %v4693_v45, %v2716_v10  ;;  %v2791_v39 = vmax.f32 %v2759_v14, 0.0 }
 0x143   :  { %v2794_v5 = vmax.f32 %v2762_v44, 0.0  ;;  %v2747_v35 = vadd.f32 %v4372_v27, %v2703_v9  ;;  %v2704_v16 = vadd.f32 %v2680_v17, %v2044_v37  ;;  %v2814_v43 = vmax.f32 %v4430_v29, %v2806_v11  ;;  %v2842_v36 = vpop.permute.xlu1 %2841  ;;  %v2837_v9 = vpop.permute.xlu0 %2836 }
 0x144   :  { %v2809_v22 = vmax.f32 %v2789_v55, %v2793_v13  ;;  %v2684_v31 = vpop.f32.mrf.mxu1 }
 0x145   :  { %v2810_v19 = vmax.f32 %v2790_v28, %v2794_v5  ;;  %v2779_v26 = vmax.f32 %v2747_v35, 0.0  ;;  %v2748_v15 = vadd.f32 %v4372_v27, %v2704_v16  ;;  %v2719_v61 = vadd.f32 %v2684_v31, %v2059_v47 }
 0x146   :  { %v2817_v38 = vmax.f32 %v4437_v52, %v2809_v22  ;;  %v2686_v4 = vpop.f32.mrf.mxu1  ;;  %v2792_v52 = vmax.f32 %v2760_v33, 0.0 }
 0x147   :  { %v2807_v18 = vmax.f32 %v2775_v7, %v2779_v26  ;;  %v2780_v34 = vmax.f32 %v2748_v15, 0.0  ;;  %v2763_v21 = vadd.f32 %v4693_v45, %v2719_v61  ;;  %v2720_v62 = vadd.f32 %v2686_v4, %v2060_v41  ;;  %v2832_v28 = vpop.permute.xlu1 %2831 }
 0x148   :  { %v2818_v37 = vmax.f32 %v4441_v60, %v2810_v19 }
 0x149   :  { %v2815_v29 = vmax.f32 %v4445_v59, %v2807_v18  ;;  %v2808_v2 = vmax.f32 %v2776_v0, %v2780_v34  ;;  %v2795_v3 = vmax.f32 %v2763_v21, 0.0  ;;  %v2764_v27 = vadd.f32 %v4693_v45, %v2720_v62  ;;  %v3056_v18 = vld [vmem:[%s4672_s5] sm:$0xff] }
 0x14a   :  { %2890 = vmatprep.subr.mxu0 %v2818_v37  ;;  %v4706_v45 = vmov 0.0  }
 0x14b   :  { %v2811_v47 = vmax.f32 %v2791_v39, %v2795_v3  ;;  %v2796_v53 = vmax.f32 %v2764_v27, 0.0  ;;  %2891 = vmatpush1.msra.mxu0 %v2817_v38  ;;  %v2816_v41 = vmax.f32 %v4455_v20, %v2808_v2  ;;  %v2823_v20 = vld [vmem:[%s4671_s3 + $0x10] sm:$0xff]  ;;  %v3057_v3 = vld [vmem:[%s4672_s5 + $0x8] sm:$0xff] }
 0x14c   :  { %2892 = vmatprep.subr.mxu0 %v2814_v43 }
 0x14d   :  { %v2819_v60 = vmax.f32 %v4462_v30, %v2811_v47  ;;  %v2812_v59 = vmax.f32 %v2792_v52, %v2796_v53  ;;  %2893 = vmatpush1.msra.mxu0 %v2813_v12  ;;  %v2824_v30 = vld [vmem:[%s4671_s3 + $0x18] sm:$0xff]  ;;  %v3058_v53 = vld [vmem:[%s4672_s5 + $0x10] sm:$0xff] }
 0x14e   :  { %3650 = vmatmul.mubr.msk.f32.vlgmr.msra.gmra.mxu0 %vm2849_vm2, %v2821_v25 }
 0x14f   :  { %2932 = vmatprep.mubr.f32.mxu0 %v4706_v45  ;;  %v2820_v48 = vmax.f32 %v4475_v40, %v2812_v59  ;;  %v3062_v59 = vld [vmem:[%s4672_s5 + $0x30] sm:$0xff] }
 0x151   :  { %2979 = vmatprep.subr.mxu1 %v2820_v48  ;;  %v3396_v48 = vld [vmem:[%s4673_s7 + $0x8] sm:$0xff] }
 0x152   :  { %3651 = vmatmul.mubr.msk.f32.gmra.mxu0 %vm2849_vm2, %v2822_v56  ;;  %2980 = vmatpush1.msra.mxu1 %v2819_v60  ;;  %v3061_v60 = vld [vmem:[%s4672_s5 + $0x28] sm:$0xff] }
 0x153   :  { %2981 = vmatprep.subr.mxu1 %v2816_v41  ;;  %2938 = vmatprep.mubr.f32.mxu0 %v4706_v45  ;;  %v3060_v41 = vld [vmem:[%s4672_s5 + $0x20] sm:$0xff] }
 0x154   :  { %2982 = vmatpush1.msra.mxu1 %v2815_v29 }
 0x155   :  { %3654 = vmatmul.mubr.msk.f32.vlgmr.msra.gmra.mxu1 %vm2849_vm2, %v2821_v25  ;;  %v3059_v25 = vld [vmem:[%s4672_s5 + $0x18] sm:$0xff] }
 0x156   :  { %3652 = vmatmul.mubr.msk.f32.gmra.mxu0 %vm2849_vm2, %v2823_v20  ;;  %3021 = vmatprep.mubr.f32.mxu1 %v4706_v45 }
 0x157   :  { %2944 = vmatprep.mubr.f32.mxu0 %v4706_v45 }
 0x159   :  { %3655 = vmatmul.mubr.msk.f32.gmra.mxu1 %vm2849_vm2, %v2822_v56  ;;  %v3063_v56 = vld [vmem:[%s4672_s5 + $0x38] sm:$0xff] }
 0x15a   :  { %3653 = vmatmul.mubr.msk.f32.gmra.mxu0 %vm2849_vm2, %v2824_v30  ;;  %3027 = vmatprep.mubr.f32.mxu1 %v4706_v45 }
 0x15b   :  { %3201 = vmatprep.mubr.f32.mxu0 %v4706_v45 }
 0x15d   :  { %3656 = vmatmul.mubr.msk.f32.gmra.mxu1 %vm2849_vm2, %v2823_v20 }
 0x15e   :  { %3033 = vmatprep.mubr.f32.mxu1 %v4706_v45 }
 0x161   :  { %3657 = vmatmul.mubr.msk.f32.gmra.mxu1 %vm2849_vm2, %v2824_v30 }
 0x162   :  { %3314 = vmatprep.mubr.f32.mxu1 %v4706_v45 }
 0x20e   :  { %v2928_v40 = vpop.f32.mrf.mxu0 }
 0x20f   :  { %v2929_v14 = vadd.f32 %v2928_v40, %v2832_v28 }
 0x210   :  { %v2930_v24 = vpop.f32.mrf.mxu0 }
 0x211   :  { %v2931_v16 = vadd.f32 %v2930_v24, %v2832_v28  ;;  %v3040_v38 = vmax.f32 %v2929_v14, 0.0 }
 0x212   :  { %v2934_v42 = vpop.f32.mrf.mxu0 }
 0x213   :  { %v2935_v5 = vadd.f32 %v2934_v42, %v2837_v9  ;;  %v3041_v61 = vmax.f32 %v2931_v16, 0.0 }
 0x214   :  { %v2936_v32 = vpop.f32.mrf.mxu0 }
 0x215   :  { %v3017_v1 = vpop.f32.mrf.mxu1  ;;  %v2937_v11 = vadd.f32 %v2936_v32, %v2837_v9  ;;  %v3044_v19 = vmax.f32 %v2935_v5, 0.0 }
 0x216   :  { %v2940_v46 = vpop.f32.mrf.mxu0  ;;  %v3018_v37 = vadd.f32 %v3017_v1, %v2832_v28 }
 0x217   :  { %v3019_v49 = vpop.f32.mrf.mxu1  ;;  %v2941_v8 = vadd.f32 %v2940_v46, %v2842_v36  ;;  %v3045_v22 = vmax.f32 %v2937_v11, 0.0 }
 0x218   :  { %v2942_v57 = vpop.f32.mrf.mxu0  ;;  %v3020_v62 = vadd.f32 %v3019_v49, %v2832_v28  ;;  %v3042_v47 = vmax.f32 %v3018_v37, 0.0  ;;  %v3105_v28 = vpop.permute.xlu1 %3104 }
 0x219   :  { %v3023_v50 = vpop.f32.mrf.mxu1  ;;  %v2943_v23 = vadd.f32 %v2942_v57, %v2842_v36  ;;  %v3048_v35 = vmax.f32 %v2941_v8, 0.0 }
 0x21a   :  { %v2946_v63 = vpop.f32.mrf.mxu0  ;;  %v3024_v34 = vadd.f32 %v3023_v50, %v2837_v9  ;;  %v3043_v52 = vmax.f32 %v3020_v62, 0.0 }
 0x21b   :  { %v2947_v51 = vadd.f32 %v2946_v63, %v2847_v6  ;;  %v3025_v54 = vpop.f32.mrf.mxu1  ;;  %v3049_v13 = vmax.f32 %v2943_v23, 0.0 }
 0x21c   :  { %v2948_v55 = vpop.f32.mrf.mxu0  ;;  %v3026_v33 = vadd.f32 %v3025_v54, %v2837_v9  ;;  %v3046_v27 = vmax.f32 %v3024_v34, 0.0 }
 0x21d   :  { %v2949_v58 = vadd.f32 %v2948_v55, %v2847_v6  ;;  %v3029_v44 = vpop.f32.mrf.mxu1  ;;  %v3052_v12 = vmax.f32 %v2947_v51, 0.0 }
 0x21e   :  { %v3030_v0 = vadd.f32 %v3029_v44, %v2842_v36  ;;  %v3047_v2 = vmax.f32 %v3026_v33, 0.0 }
 0x21f   :  { %v3053_v10 = vmax.f32 %v2949_v58, 0.0  ;;  %v3031_v17 = vpop.f32.mrf.mxu1 }
 0x220   :  { %v3032_v26 = vadd.f32 %v3031_v17, %v2842_v36  ;;  %v3050_v29 = vmax.f32 %v3030_v0, 0.0 }
 0x221   :  { %3161 = vmatprep.subr.mxu0 %v3053_v10  ;;  %v3035_v7 = vpop.f32.mrf.mxu1 }
 0x222   :  { %3162 = vmatpush1.msra.mxu0 %v3052_v12  ;;  %v3036_v31 = vadd.f32 %v3035_v7, %v2847_v6  ;;  %v3051_v39 = vmax.f32 %v3032_v26, 0.0 }
 0x223   :  { %3163 = vmatprep.subr.mxu0 %v3049_v13  ;;  %v3037_v43 = vpop.f32.mrf.mxu1  ;;  %v3110_v13 = vpop.permute.xlu0 %3109 }
 0x224   :  { %v3038_v15 = vadd.f32 %v3037_v43, %v2847_v6  ;;  %3164 = vmatpush1.msra.mxu0 %v3048_v35  ;;  %v3054_v21 = vmax.f32 %v3036_v31, 0.0 }
 0x225   :  { %3165 = vmatprep.subr.mxu0 %v3045_v22  ;;  %v4616_v22 = vpop.permute.xlu1 %3094 }
 0x226   :  { %v3055_v4 = vmax.f32 %v3038_v15, 0.0  ;;  %3166 = vmatpush1.msra.mxu0 %v3044_v19 }
 0x227   :  { %3167 = vmatprep.subr.mxu0 %v3041_v61  ;;  %v3100_v7 = vpop.permute.xlu0 %3099 }
 0x228   :  { %3168 = vmatpush1.msra.mxu0 %v3040_v38  ;;  %3274 = vmatprep.subr.mxu1 %v3055_v4 }
 0x229   :  { %3658 = vmatmul.mubr.msk.f32.vlgmr.msra.gmra.mxu0 %vm3112_vm3, %v3056_v18  ;;  %3275 = vmatpush1.msra.mxu1 %v3054_v21  ;;  %v4621_v21 = vpop.permute.xlu1 %3084 }
 0x22a   :  { %3276 = vmatprep.subr.mxu1 %v3051_v39  ;;  %3207 = vmatprep.mubr.f32.mxu0 %v4706_v45 }
 0x22b   :  { %3277 = vmatpush1.msra.mxu1 %v3050_v29  ;;  %v4618_v38 = vpop.permute.xlu0 %3089 }
 0x22c   :  { %3278 = vmatprep.subr.mxu1 %v3047_v2 }
 0x22d   :  { %3659 = vmatmul.mubr.msk.f32.gmra.mxu0 %vm3112_vm3, %v3057_v3  ;;  %3279 = vmatpush1.msra.mxu1 %v3046_v27 }
 0x22e   :  { %3280 = vmatprep.subr.mxu1 %v3043_v52  ;;  %3213 = vmatprep.mubr.f32.mxu0 %v4706_v45 }
 0x22f   :  { %3281 = vmatpush1.msra.mxu1 %v3042_v47  ;;  %v3080_v47 = vpop.permute.xlu0 %3079 }
 0x230   :  { %3666 = vmatmul.mubr.msk.f32.vlgmr.msra.gmra.mxu1 %vm3112_vm3, %v3056_v18 }
 0x231   :  { %3660 = vmatmul.mubr.msk.f32.gmra.mxu0 %vm3112_vm3, %v3058_v53  ;;  %3320 = vmatprep.mubr.f32.mxu1 %v4706_v45 }
 0x232   :  { %3219 = vmatprep.mubr.f32.mxu0 %v4706_v45 }
 0x234   :  { %3667 = vmatmul.mubr.msk.f32.gmra.mxu1 %vm3112_vm3, %v3057_v3 }
 0x235   :  { %3661 = vmatmul.mubr.msk.f32.gmra.mxu0 %vm3112_vm3, %v3059_v25  ;;  %3326 = vmatprep.mubr.f32.mxu1 %v4706_v45 }
 0x236   :  { %3225 = vmatprep.mubr.f32.mxu0 %v4706_v45 }
 0x238   :  { %3668 = vmatmul.mubr.msk.f32.gmra.mxu1 %vm3112_vm3, %v3058_v53 }
 0x239   :  { %3662 = vmatmul.mubr.msk.f32.gmra.mxu0 %vm3112_vm3, %v3060_v41  ;;  %3332 = vmatprep.mubr.f32.mxu1 %v4706_v45 }
 0x23a   :  { %3231 = vmatprep.mubr.f32.mxu0 %v4706_v45 }
 0x23c   :  { %3669 = vmatmul.mubr.msk.f32.gmra.mxu1 %vm3112_vm3, %v3059_v25 }
 0x23d   :  { %3663 = vmatmul.mubr.msk.f32.gmra.mxu0 %vm3112_vm3, %v3061_v60  ;;  %3338 = vmatprep.mubr.f32.mxu1 %v4706_v45 }
 0x23e   :  { %3237 = vmatprep.mubr.f32.mxu0 %v4706_v45 }
 0x240   :  { %3670 = vmatmul.mubr.msk.f32.gmra.mxu1 %vm3112_vm3, %v3060_v41 }
 0x241   :  { %3664 = vmatmul.mubr.msk.f32.gmra.mxu0 %vm3112_vm3, %v3062_v59  ;;  %3344 = vmatprep.mubr.f32.mxu1 %v4706_v45 }
 0x242   :  { %3243 = vmatprep.mubr.f32.mxu0 %v4706_v45 }
 0x244   :  { %3671 = vmatmul.mubr.msk.f32.gmra.mxu1 %vm3112_vm3, %v3061_v60 }
 0x245   :  { %3665 = vmatmul.mubr.msk.f32.gmra.mxu0 %vm3112_vm3, %v3063_v56  ;;  %3350 = vmatprep.mubr.f32.mxu1 %v4706_v45 }
 0x246   :  { %3475 = vmatprep.mubr.f32.mxu0 %v3396_v48 }
 0x248   :  { %3672 = vmatmul.mubr.msk.f32.gmra.mxu1 %vm3112_vm3, %v3062_v59  ;;  %v3075_v59 = vpop.permute.xlu1 %3074 }
 0x249   :  { %3356 = vmatprep.mubr.f32.mxu1 %v4706_v45 }
 0x24c   :  { %3673 = vmatmul.mubr.msk.f32.gmra.mxu1 %vm3112_vm3, %v3063_v56 }
 0x2e9   :  { %v4584_v20 = vpop.f32.mrf.mxu0 }
 0x2eb   :  { %v4586_v30 = vpop.f32.mrf.mxu0 }
 0x2ed   :  { %v4588_v40 = vpop.f32.mrf.mxu0 }
 0x2ef   :  { %v4590_v24 = vpop.f32.mrf.mxu0 }
 0x2f0   :  { %v4592_v42 = vpop.f32.mrf.mxu1  ;;  %v3212_v56 = vadd.f32 %v4590_v24, %v3080_v47 }
 0x2f1   :  { %v4594_v6 = vpop.f32.mrf.mxu0 }
 0x2f2   :  { %v4596_v45 = vpop.f32.mrf.mxu1 }
 0x2f3   :  { %v3217_v32 = vpop.f32.mrf.mxu0 }
 0x2f4   :  { %v4598_v1 = vpop.f32.mrf.mxu1  ;;  %v3218_v53 = vadd.f32 %v3217_v32, %v4621_v21 }
 0x2f5   :  { %v4600_v46 = vpop.f32.mrf.mxu0 }
 0x2f6   :  { %v3324_v49 = vpop.f32.mrf.mxu1 }
 0x2f7   :  { %v3223_v57 = vpop.f32.mrf.mxu0  ;;  %v3325_v41 = vadd.f32 %v3324_v49, %v3080_v47 }
 0x2f8   :  { %v4602_v50 = vpop.f32.mrf.mxu1  ;;  %v3224_v2 = vadd.f32 %v3223_v57, %v4618_v38  ;;  %v3319_v57 = vadd.f32 %v4596_v45, %v3075_v59 }
 0x2f9   :  { %v4604_v36 = vpop.f32.mrf.mxu0 }
 0x2fa   :  { %v3330_v63 = vpop.f32.mrf.mxu1  ;;  %v3376_v48 = vmax.f32 %v3224_v2, 0.0 }
 0x2fb   :  { %v3229_v23 = vpop.f32.mrf.mxu0  ;;  %v3331_v27 = vadd.f32 %v3330_v63, %v4621_v21  ;;  %v3206_v63 = vadd.f32 %v4586_v30, %v3075_v59 }
 0x2fc   :  { %v4606_v51 = vpop.f32.mrf.mxu1  ;;  %v3230_v62 = vadd.f32 %v3229_v23, %v4616_v22 }
 0x2fd   :  { %v4608_v54 = vpop.f32.mrf.mxu0  ;;  %v3374_v23 = vmax.f32 %v3331_v27, 0.0  ;;  %v3364_v24 = vmax.f32 %v3206_v63, 0.0 }
 0x2fe   :  { %v3336_v8 = vpop.f32.mrf.mxu1  ;;  %v3380_v25 = vmax.f32 %v3230_v62, 0.0  ;;  %v3234_v30 = vadd.f32 %v4608_v54, %v3100_v7  ;;  %v3222_v54 = vadd.f32 %v4600_v46, %v4618_v38  ;;  %v3317_v46 = vadd.f32 %v4592_v42, %v3075_v59  ;;  %v3398_v42 = vld [vmem:[%s4673_s7 + $0x18] sm:$0x1] }
 0x2ff   :  { %v3235_v55 = vpop.f32.mrf.mxu0  ;;  %v3337_v37 = vadd.f32 %v3336_v8, %v4618_v38  ;;  %v3372_v8 = vmax.f32 %v3218_v53, 0.0 }
 0x300   :  { %v4610_v58 = vpop.f32.mrf.mxu1  ;;  %v3236_v33 = vadd.f32 %v3235_v55, %v3100_v7  ;;  %v3370_v55 = vmax.f32 %v3325_v41, 0.0 }
 0x301   :  { %v4612_v44 = vpop.f32.mrf.mxu0  ;;  %v3378_v60 = vmax.f32 %v3337_v37, 0.0 }
 0x302   :  { %v3342_v9 = vpop.f32.mrf.mxu1  ;;  %v3384_v3 = vmax.f32 %v3236_v33, 0.0 }
 0x303   :  { %v3241_v12 = vpop.f32.mrf.mxu0  ;;  %v3343_v18 = vadd.f32 %v3342_v9, %v4616_v22  ;;  %v3368_v9 = vmax.f32 %v3212_v56, 0.0 }
 0x304   :  { %v4614_v11 = vpop.f32.mrf.mxu1  ;;  %v3242_v15 = vadd.f32 %v3241_v12, %v3105_v28  ;;  %v3366_v12 = vmax.f32 %v3319_v57, 0.0 }
 0x305   :  { %v3245_v17 = vpop.f32.mrf.mxu0  ;;  %v3382_v52 = vmax.f32 %v3343_v18, 0.0  ;;  %v3347_v45 = vadd.f32 %v4614_v11, %v3100_v7 }
 0x306   :  { %v3348_v10 = vpop.f32.mrf.mxu1  ;;  %v3388_v39 = vmax.f32 %v3242_v15, 0.0  ;;  %v3246_v49 = vadd.f32 %v3245_v17, %v3110_v13  ;;  %v3228_v17 = vadd.f32 %v4604_v36, %v4616_v22  ;;  %v3216_v36 = vadd.f32 %v4594_v6, %v4621_v21 }
 0x307   :  { %v3247_v16 = vpop.f32.mrf.mxu0  ;;  %v3349_v61 = vadd.f32 %v3348_v10, %v3100_v7  ;;  %v3385_v11 = vmax.f32 %v3347_v45, 0.0 }
 0x308   :  { %v3352_v5 = vpop.f32.mrf.mxu1  ;;  %v3248_v31 = vadd.f32 %v3247_v16, %v3110_v13 }
 0x309   :  { %v3386_v29 = vmax.f32 %v3349_v61, 0.0  ;;  %v3353_v10 = vadd.f32 %v3352_v5, %v3105_v28  ;;  %v3371_v61 = vmax.f32 %v3216_v36, 0.0 }
 0x30a   :  { %v3354_v35 = vpop.f32.mrf.mxu1  ;;  %v3392_v4 = vmax.f32 %v3248_v31, 0.0  ;;  %v3391_v31 = vmax.f32 %v3246_v49, 0.0 }
 0x30b   :  { %v3355_v19 = vadd.f32 %v3354_v35, %v3105_v28  ;;  %v3240_v35 = vadd.f32 %v4612_v44, %v3105_v28  ;;  %v3335_v44 = vadd.f32 %v4606_v51, %v4618_v38  ;;  %v3383_v28 = vmax.f32 %v3234_v30, 0.0 }
 0x30c   :  { %v3358_v14 = vpop.f32.mrf.mxu1  ;;  %v3365_v38 = vmax.f32 %v3317_v46, 0.0 }
 0x30d   :  { %v3390_v34 = vmax.f32 %v3355_v19, 0.0  ;;  %v3359_v32 = vadd.f32 %v3358_v14, %v3110_v13  ;;  %v3341_v14 = vadd.f32 %v4610_v58, %v4616_v22  ;;  %v3387_v5 = vmax.f32 %v3240_v35, 0.0 }
 0x30e   :  { %v3360_v43 = vpop.f32.mrf.mxu1  ;;  %v3329_v58 = vadd.f32 %v4602_v50, %v4621_v21  ;;  %v3379_v22 = vmax.f32 %v3228_v17, 0.0  ;;  %v3377_v51 = vmax.f32 %v3335_v44, 0.0  ;;  %v3210_v19 = vadd.f32 %v4588_v40, %v3080_v47  ;;  %v3395_v40 = vld [vmem:[%s4673_s7] sm:$0xff] }
 0x30f   :  { %v3361_v26 = vadd.f32 %v3360_v43, %v3110_v13  ;;  %v3393_v16 = vmax.f32 %v3359_v32, 0.0  ;;  %v3389_v13 = vmax.f32 %v3353_v10, 0.0  ;;  %v3381_v7 = vmax.f32 %v3341_v14, 0.0 }
 0x310   :  { %v3323_v43 = vadd.f32 %v4598_v1, %v3080_v47  ;;  %v3373_v15 = vmax.f32 %v3329_v58, 0.0  ;;  %v3204_v50 = vadd.f32 %v4584_v20, %v3075_v59  ;;  %v3367_v6 = vmax.f32 %v3210_v19, 0.0  ;;  %v3397_v20 = vld [vmem:[%s4673_s7 + $0x10] sm:$0x1] }
 0x311   :  { %v3394_v0 = vmax.f32 %v3361_v26, 0.0  ;;  %v3375_v26 = vmax.f32 %v3222_v54, 0.0 }
 0x312   :  { %v3363_v1 = vmax.f32 %v3204_v50, 0.0 }
 0x313   :  { %3674 = vmatprep.subr.mxu0 %v3394_v0  ;;  %v3369_v0 = vmax.f32 %v3323_v43, 0.0 }
 0x314   :  { %3675 = vmatpush3.msra.mxu0 %v3392_v4 }
 0x315   :  { %3676 = vmatprep.subr.mxu0 %v3390_v34  ;;  %v3404_v34 = vpop.permute.xlu0 %3403 }
 0x316   :  { %3677 = vmatpush3.msra.mxu0 %v3388_v39 }
 0x317   :  { %3678 = vmatprep.subr.mxu0 %v3386_v29  ;;  %v3409_v29 = vpop.permute.xlu1 %3408 }
 0x318   :  { %3679 = vmatpush3.msra.mxu0 %v3384_v3 }
 0x319   :  { %3680 = vmatprep.subr.mxu0 %v3382_v52 }
 0x31a   :  { %3681 = vmatpush3.msra.mxu0 %v3380_v25 }
 0x31b   :  { %3682 = vmatprep.subr.mxu0 %v3378_v60 }
 0x31c   :  { %3683 = vmatpush3.msra.mxu0 %v3376_v48 }
 0x31d   :  { %3684 = vmatprep.subr.mxu0 %v3374_v23 }
 0x31e   :  { %3685 = vmatpush3.msra.mxu0 %v3372_v8 }
 0x31f   :  { %3686 = vmatprep.subr.mxu0 %v3370_v55 }
 0x320   :  { %3687 = vmatpush3.msra.mxu0 %v3368_v9 }
 0x321   :  { %3688 = vmatprep.subr.mxu0 %v3366_v12 }
 0x322   :  { %3689 = vmatpush3.msra.mxu0 %v3364_v24 }
 0x323   :  { %3690 = vmatprep.subr.mxu0 %v3393_v16 }
 0x324   :  { %3691 = vmatpush3.msra.mxu0 %v3391_v31 }
 0x325   :  { %3692 = vmatprep.subr.mxu0 %v3389_v13 }
 0x326   :  { %3693 = vmatpush3.msra.mxu0 %v3387_v5 }
 0x327   :  { %3694 = vmatprep.subr.mxu0 %v3385_v11 }
 0x328   :  { %3695 = vmatpush3.msra.mxu0 %v3383_v28 }
 0x329   :  { %3696 = vmatprep.subr.mxu0 %v3381_v7 }
 0x32a   :  { %3697 = vmatpush3.msra.mxu0 %v3379_v22 }
 0x32b   :  { %3698 = vmatprep.subr.mxu0 %v3377_v51 }
 0x32c   :  { %3699 = vmatpush3.msra.mxu0 %v3375_v26 }
 0x32d   :  { %3700 = vmatprep.subr.mxu0 %v3373_v15 }
 0x32e   :  { %3701 = vmatpush3.msra.mxu0 %v3371_v61 }
 0x32f   :  { %3702 = vmatprep.subr.mxu0 %v3369_v0 }
 0x330   :  { %3703 = vmatpush3.msra.mxu0 %v3367_v6 }
 0x331   :  { %3704 = vmatprep.subr.mxu0 %v3365_v38 }
 0x332   :  { %3705 = vmatpush3.msra.mxu0 %v3363_v1 }
 0x333   :  { %3476 = vmatmul.mubr.f32.vlgmr.msra.gmra.mxu0 %v3395_v40 }
 0x334   :  { %3480 = vmatprep.mubr.f32.mxu0 %v3398_v42 }
 0x337   :  { %3481 = vmatmul.mubr.f32.gmra.mxu0 %v3397_v20 }
 0x3f3   :  { %v3706_v33 = vpop.f32.mrf.mxu0 }
 0x3f5   :  { %v3707_v4 = vpop.f32.mrf.mxu0 }
 0x3f6   :  { %v3708_v18 = vadd.f32 %v3707_v4, %v3706_v33 }
 0x3f7   :  { %v3709_v21 = vpop.f32.mrf.mxu0 }
 0x3f8   :  { %v3478_v62 = vadd.f32 %v3708_v18, %v3404_v34 }
 0x3f9   :  { %v3710_v39 = vpop.f32.mrf.mxu0 }
 0x3fa   :  { %3486 = vst [vmem:[%s4674_s9] sm:$0xff] %v3478_v62  ;;  %v3711_v37 = vadd.f32 %v3710_v39, %v3709_v21 }
 0x3fc   :  { %v3483_v2 = vadd.f32 %v3711_v37, %v3409_v29 }
 0x3fe   :  { %3487 = vst [vmem:[%s4674_s9 + $0x8] sm:$0x1] %v3483_v2 }

</bundles_post_ra>
